<compile_context>
chip_gen: v7x
topology: tpu7x:2x2x1
jax: 0.10.0
libtpu: 0.0.40
codegen_flags: <defaults>
</compile_context>

<pallas_src>
import math
import jax
import jax.numpy as jnp
from jax.experimental import pallas as pl
from jax.experimental.pallas import tpu as pltpu


def make_decoder_kernel(num_heads, num_kv_heads, head_dim, seq_len, hidden,
                        inter, eps):
    kv_rep = num_heads // num_kv_heads
    half = head_dim // 2
    scale = 1.0 / math.sqrt(head_dim)
    S, H, I = seq_len, hidden, inter

    def kernel(x_ref, cs_ref, ln1_ref, wq_ref, wk_ref, wv_ref, wo_ref,
               ln2_ref, wgu_ref, wd_ref, out_ref, attn_ref):
        x = x_ref[0]                                        # (S, H) f32

        # ---- input RMSNorm (f32); single bf16 cast feeds all projections ----
        var = jnp.mean(x * x, axis=-1, keepdims=True)
        xn = (x * jax.lax.rsqrt(var + eps)) * ln1_ref[0]
        xn_b = xn.astype(jnp.bfloat16)

        # ---- q / k / v projections (bf16 MXU, f32 accumulate) ----
        q = jnp.dot(xn_b, wq_ref[...], preferred_element_type=jnp.float32)
        k = jnp.dot(xn_b, wk_ref[...], preferred_element_type=jnp.float32)
        v = jnp.dot(xn_b, wv_ref[...],
                    preferred_element_type=jnp.float32).astype(jnp.bfloat16)

        # ---- RoPE tables (packed cos|sin) + causal mask, no tiling ----
        cos = cs_ref[:, :half]                              # (S, half) f32
        sin = cs_ref[:, half:]
        rows = jax.lax.broadcasted_iota(jnp.int32, (S, S), 0)
        cols = jax.lax.broadcasted_iota(jnp.int32, (S, S), 1)
        neg = jnp.where(rows >= cols, 0.0, -1e30)           # (S, S) causal mask

        def rope(t):
            # q/k columns are host-permuted to split-half layout, so RoPE is
            # pure VPU math: out = [t1*c - t2*s , t2*c + t1*s]
            t1 = t[:, :half]
            t2 = t[:, half:]
            return jnp.concatenate([t1 * cos - t2 * sin, t2 * cos + t1 * sin],
                                   axis=-1)

        # ---- GQA attention, one query head at a time (M = S per matmul) ----
        for g in range(num_kv_heads):
            k_g = rope(k[:, g * head_dim:(g + 1) * head_dim]).astype(jnp.bfloat16)
            v_g = v[:, g * head_dim:(g + 1) * head_dim]     # (S, hd) bf16
            for h in range(kv_rep):
                hh = g * kv_rep + h
                q_h = rope(q[:, hh * head_dim:(hh + 1) * head_dim]
                           ).astype(jnp.bfloat16)           # (S, hd)
                # scores: contract last dims directly (no k transpose)
                s_raw = jax.lax.dot_general(
                    q_h, k_g, (((1,), (1,)), ((), ())),
                    preferred_element_type=jnp.float32) * scale + neg
                s_raw = s_raw - jnp.max(s_raw, axis=-1, keepdims=True)
                p = jnp.exp(s_raw)
                p = p * pl.reciprocal(jnp.sum(p, axis=-1, keepdims=True),
                                      approx=True)
                o_h = jnp.dot(p.astype(jnp.bfloat16), v_g,
                              preferred_element_type=jnp.float32)   # (S, hd)
                attn_ref[:, hh * head_dim:(hh + 1) * head_dim] = \
                    o_h.astype(jnp.bfloat16)

        # ---- single large-K o_proj (K = H) + residual ----
        o = jnp.dot(attn_ref[...], wo_ref[...],
                    preferred_element_type=jnp.float32)     # (S, H) f32
        h1 = x + o

        # ---- post-attention RMSNorm + fused gate|up SwiGLU MLP ----
        var2 = jnp.mean(h1 * h1, axis=-1, keepdims=True)
        hn_b = ((h1 * jax.lax.rsqrt(var2 + eps)) * ln2_ref[0]).astype(jnp.bfloat16)
        gu = jnp.dot(hn_b, wgu_ref[...],
                     preferred_element_type=jnp.float32)    # (S, 2I) f32
        gate = gu[:, :I]
        up = gu[:, I:]
        act = gate * jax.nn.sigmoid(gate)                   # SiLU in f32
        mlp = jnp.dot((act * up).astype(jnp.bfloat16), wd_ref[...],
                      preferred_element_type=jnp.float32)

        out_ref[0] = h1 + mlp                               # residual

    return kernel


def brahma_decoder_layer(x, freqs_cos, freqs_sin, params, *,
                         num_heads, num_kv_heads, eps=1e-6):
    B, S, H = x.shape
    hd = H // num_heads
    half = hd // 2
    Hkv = num_kv_heads * hd
    I = params["w_gate"].shape[1]

    # Host-side: permute q/k projection columns into per-head split-half RoPE
    # layout ([even dims | odd dims]); q.k dot products are invariant to the
    # same per-head permutation applied to both.
    perm_head = jnp.concatenate(
        [2 * jnp.arange(half), 2 * jnp.arange(half) + 1])              # (hd,)
    perm_q = (jnp.arange(num_heads)[:, None] * hd + perm_head[None, :]).reshape(-1)
    perm_k = (jnp.arange(num_kv_heads)[:, None] * hd + perm_head[None, :]).reshape(-1)

    wq = params["w_q"][:, perm_q].astype(jnp.bfloat16)
    wk = params["w_k"][:, perm_k].astype(jnp.bfloat16)
    wv = params["w_v"].astype(jnp.bfloat16)
    wo = params["w_o"].astype(jnp.bfloat16)
    wgu = jnp.concatenate([params["w_gate"], params["w_up"]],
                          axis=1).astype(jnp.bfloat16)                 # (H, 2I)
    wd = params["w_down"].astype(jnp.bfloat16)
    ln1 = params["ln1"].reshape(1, H).astype(jnp.float32)
    ln2 = params["ln2"].reshape(1, H).astype(jnp.float32)
    cs = jnp.concatenate([freqs_cos, freqs_sin], axis=1).astype(jnp.float32)  # (S, hd)

    kernel = make_decoder_kernel(num_heads, num_kv_heads, hd, S, H, I, eps)
    args = (x, cs, ln1, wq, wk, wv, wo, ln2, wgu, wd)

    # Physical VMEM capacity (v5e/v6e 128 MiB, v7x 64 MiB); conservative fallback.
    try:
        cap = int(pltpu.get_tpu_info().vmem_capacity_bytes)
    except Exception:
        cap = 64 << 20

    def build(single_buffer_invariants):
        def inv(shape):
            # Grid-invariant inputs: constant index_map over the batch grid.
            kw = {"pipeline_mode": pl.Buffered(1)} if single_buffer_invariants else {}
            return pl.BlockSpec(shape, lambda b, _n=len(shape): (0,) * _n, **kw)

        in_specs = [
            pl.BlockSpec((1, S, H), lambda b: (b, 0, 0)),   # x
            inv((S, hd)),                                   # packed cos|sin
            inv((1, H)),                                    # ln1
            inv((H, H)), inv((H, Hkv)), inv((H, Hkv)),      # w_q, w_k, w_v
            inv((H, H)),                                    # w_o
            inv((1, H)),                                    # ln2
            inv((H, 2 * I)), inv((I, H)),                   # w_gate|up, w_down
        ]
        out_spec = pl.BlockSpec((1, S, H), lambda b: (b, 0, 0))

        # Resident-set estimate for vmem_limit_bytes (clamped to the chip).
        mult = 1 if single_buffer_invariants else 2
        weight_bytes = mult * 2 * (2 * H * H + 2 * H * Hkv + 3 * H * I)
        table_bytes = mult * (S * hd * 4 + 2 * H * 4)
        io_bytes = 2 * 2 * S * H * 4                        # x + out, double-buffered
        scratch_bytes = S * H * 2                           # bf16 attention scratch
        temp_bytes = (6 * S * H * 4 + 3 * S * S * 4 + 3 * S * I * 4
                      + 2 * S * Hkv * 4)
        est = (weight_bytes + table_bytes + io_bytes + scratch_bytes
               + temp_bytes + (4 << 20))
        vmem_limit = int(min(max(est, 32 << 20), int(cap * 0.9)))

        # TODO(synk): on v7x add a second "parallel" grid axis over Q-row tiles
        #   so both TensorCores are used when B == 1 or odd.
        return pl.pallas_call(
            kernel,
            out_shape=jax.ShapeDtypeStruct((B, S, H), jnp.float32),
            grid_spec=pltpu.PrefetchScalarGridSpec(
                num_scalar_prefetch=0,
                grid=(B,),
                in_specs=in_specs,
                out_specs=out_spec,
                scratch_shapes=[pltpu.VMEM((S, H), jnp.bfloat16)]),
            compiler_params=pltpu.CompilerParams(
                dimension_semantics=("parallel",),
                vmem_limit_bytes=vmem_limit),
        )

    try:
        out = build(True)(*args)
        jax.block_until_ready(out)
        return out
    except Exception:
        # Fallback: default double-buffered specs (correct, just more VMEM)
        # in case pl.Buffered(1) is rejected by the installed JAX version.
        out = build(False)(*args)
        jax.block_until_ready(out)
        return out


def ref_decoder_layer(x, freqs_cos, freqs_sin, params, *,
                      num_heads, num_kv_heads, eps=1e-6):
    """Pure-JAX f32 reference mirroring the PyTorch forward (use_cache=False)."""
    B, S, H = x.shape
    hd = H // num_heads
    kv_rep = num_heads // num_kv_heads
    mask = jnp.where(jnp.arange(S)[:, None] >= jnp.arange(S)[None, :],
                     0.0, -1e9).astype(jnp.float32)

    def rms(v_, w):
        var = jnp.mean(v_ * v_, axis=-1, keepdims=True)
        return w * (v_ * jax.lax.rsqrt(var + eps))

    def rope(t, n_heads):
        tr = t.reshape(B, S, n_heads, hd // 2, 2)
        c = freqs_cos[None, :, None, :]
        s = freqs_sin[None, :, None, :]
        o0 = tr[..., 0] * c - tr[..., 1] * s
        o1 = tr[..., 0] * s + tr[..., 1] * c
        return jnp.stack([o0, o1], axis=-1).reshape(B, S, n_heads * hd)

    xn = rms(x, params["ln1"])
    q = xn @ params["w_q"]
    k = xn @ params["w_k"]
    v = xn @ params["w_v"]
    q = rope(q, num_heads).reshape(B, S, num_heads, hd)
    k = rope(k, num_kv_heads).reshape(B, S, num_kv_heads, hd)
    v = v.reshape(B, S, num_kv_heads, hd)
    k = jnp.repeat(k, kv_rep, axis=2)
    v = jnp.repeat(v, kv_rep, axis=2)
    s = jnp.einsum('bqhd,bkhd->bhqk', q, k) / math.sqrt(hd) + mask[None, None]
    p = jax.nn.softmax(s, axis=-1)
    o = jnp.einsum('bhqk,bkhd->bqhd', p, v).reshape(B, S, H)
    h1 = x + o @ params["w_o"]
    hn = rms(h1, params["ln2"])
    mlp = (jax.nn.silu(hn @ params["w_gate"]) * (hn @ params["w_up"])) @ params["w_down"]
    return h1 + mlp


if __name__ == "__main__":
    # Small config consistent with the module: H divisible by heads, GQA 4->2.
    B, S = 2, 8
    H, nH, nKV = 32, 4, 2
    hd = H // nH
    I = 64
    theta = 10000.0

    key = jax.random.PRNGKey(0)
    keys = jax.random.split(key, 8)
    init = lambda k, shape: (0.02 * jax.random.normal(k, shape)).astype(jnp.float32)

    params = {
        "ln1": jnp.ones((H,), jnp.float32),        # RMSNorm init = ones
        "ln2": jnp.ones((H,), jnp.float32),
        "w_q": init(keys[0], (H, nH * hd)),
        "w_k": init(keys[1], (H, nKV * hd)),
        "w_v": init(keys[2], (H, nKV * hd)),
        "w_o": init(keys[3], (nH * hd, H)),
        "w_gate": init(keys[4], (H, I)),
        "w_up": init(keys[5], (H, I)),
        "w_down": init(keys[6], (I, H)),
    }
    x = jax.random.normal(keys[7], (B, S, H), jnp.float32)

    # RoPE frequencies: (S, head_dim // 2)
    pos = jnp.arange(S, dtype=jnp.float32)
    inv_freq = 1.0 / (theta ** (jnp.arange(0, hd, 2, dtype=jnp.float32) / hd))
    angles = pos[:, None] * inv_freq[None, :]
    freqs_cos = jnp.cos(angles)
    freqs_sin = jnp.sin(angles)

    out = brahma_decoder_layer(x, freqs_cos, freqs_sin, params,
                               num_heads=nH, num_kv_heads=nKV, eps=1e-6)
    jax.block_until_ready(out)

    ref = ref_decoder_layer(x, freqs_cos, freqs_sin, params,
                            num_heads=nH, num_kv_heads=nKV, eps=1e-6)
    err = float(jnp.max(jnp.abs(out - ref)))
    assert jnp.allclose(out, ref, atol=1e-2, rtol=1e-2), f"max abs err {err}"
    print("KERNEL_OK")
</pallas_src>

<mosaic_0001>
module attributes {stable_mosaic.version = 11 : i64} {
  func.func @kernel(%arg0: i32, %arg1: memref<1x8x32xf32, #tpu.memory_space<vmem>>, %arg2: memref<8x8xf32, #tpu.memory_space<vmem>>, %arg3: memref<1x32xf32, #tpu.memory_space<vmem>>, %arg4: memref<32x32xbf16, #tpu.memory_space<vmem>>, %arg5: memref<32x16xbf16, #tpu.memory_space<vmem>>, %arg6: memref<32x16xbf16, #tpu.memory_space<vmem>>, %arg7: memref<32x32xbf16, #tpu.memory_space<vmem>>, %arg8: memref<1x32xf32, #tpu.memory_space<vmem>>, %arg9: memref<32x128xbf16, #tpu.memory_space<vmem>>, %arg10: memref<64x32xbf16, #tpu.memory_space<vmem>>, %arg11: memref<1x8x32xf32, #tpu.memory_space<vmem>>, %arg12: memref<8x32xbf16, #tpu.memory_space<vmem>>) attributes {dimension_semantics = [#tpu.dimension_semantics<parallel>], iteration_bounds = array<i64: 2>, scalar_prefetch = 0 : i64, scratch_operands = 1 : i64, tpu.core_type = #tpu.core_type<tc>, window_params = [{transform_indices = @transform_0, window_bounds = array<i64: 1, 8, 32>}, {pipeline_mode = #tpu.pipeline_mode<synchronous>, transform_indices = @transform_1, window_bounds = array<i64: 8, 8>}, {pipeline_mode = #tpu.pipeline_mode<synchronous>, transform_indices = @transform_2, window_bounds = array<i64: 1, 32>}, {pipeline_mode = #tpu.pipeline_mode<synchronous>, transform_indices = @transform_3, window_bounds = array<i64: 32, 32>}, {pipeline_mode = #tpu.pipeline_mode<synchronous>, transform_indices = @transform_4, window_bounds = array<i64: 32, 16>}, {pipeline_mode = #tpu.pipeline_mode<synchronous>, transform_indices = @transform_5, window_bounds = array<i64: 32, 16>}, {pipeline_mode = #tpu.pipeline_mode<synchronous>, transform_indices = @transform_6, window_bounds = array<i64: 32, 32>}, {pipeline_mode = #tpu.pipeline_mode<synchronous>, transform_indices = @transform_7, window_bounds = array<i64: 1, 32>}, {pipeline_mode = #tpu.pipeline_mode<synchronous>, transform_indices = @transform_8, window_bounds = array<i64: 32, 128>}, {pipeline_mode = #tpu.pipeline_mode<synchronous>, transform_indices = @transform_9, window_bounds = array<i64: 64, 32>}, {transform_indices = @transform_10, window_bounds = array<i64: 1, 8, 32>}]} {
    %c0 = arith.constant 0 : index
    %c0_0 = arith.constant 0 : index
    %c0_1 = arith.constant 0 : index
    %0 = vector.load %arg1[%c0, %c0_0, %c0_1] : memref<1x8x32xf32, #tpu.memory_space<vmem>>, vector<1x8x32xf32>
    %1 = vector.shape_cast %0 : vector<1x8x32xf32> to vector<8x32xf32>
    %2 = arith.mulf %1, %1 : vector<8x32xf32>
    %cst = arith.constant dense<0.000000e+00> : vector<8xf32>
    %3 = vector.multi_reduction <add>, %2, %cst [1] : vector<8x32xf32> to vector<8xf32>
    %4 = vector.shape_cast %3 : vector<8xf32> to vector<8x1xf32>
    %cst_2 = arith.constant 3.200000e+01 : f32
    %5 = vector.broadcast %cst_2 : f32 to vector<8x1xf32>
    %6 = arith.divf %4, %5 : vector<8x1xf32>
    %cst_3 = arith.constant 9.99999997E-7 : f32
    %7 = vector.broadcast %cst_3 : f32 to vector<8x1xf32>
    %8 = arith.addf %6, %7 : vector<8x1xf32>
    %9 = math.rsqrt %8 : vector<8x1xf32>
    %10 = vector.broadcast %9 : vector<8x1xf32> to vector<8x32xf32>
    %11 = arith.mulf %1, %10 : vector<8x32xf32>
    %c0_4 = arith.constant 0 : index
    %c0_5 = arith.constant 0 : index
    %12 = vector.load %arg3[%c0_4, %c0_5] : memref<1x32xf32, #tpu.memory_space<vmem>>, vector<1x32xf32>
    %13 = vector.shape_cast %12 : vector<1x32xf32> to vector<32xf32>
    %14 = vector.shape_cast %13 : vector<32xf32> to vector<1x32xf32>
    %15 = vector.broadcast %14 : vector<1x32xf32> to vector<8x32xf32>
    %16 = arith.mulf %11, %15 : vector<8x32xf32>
    %17 = arith.truncf %16 : vector<8x32xf32> to vector<8x32xbf16>
    %c0_6 = arith.constant 0 : index
    %c0_7 = arith.constant 0 : index
    %18 = vector.load %arg4[%c0_6, %c0_7] : memref<32x32xbf16, #tpu.memory_space<vmem>>, vector<32x32xbf16>
    %cst_8 = arith.constant dense<0.000000e+00> : vector<8x32xf32>
    %19 = tpu.matmul %17, %18, %cst_8 {dimension_numbers = #tpu.dot_dimension_numbers<[1], [0], [0], [1], [0, 0, 1, 1], [], []>} : vector<8x32xbf16>, vector<32x32xbf16>, vector<8x32xf32> -> vector<8x32xf32>
    %c0_9 = arith.constant 0 : index
    %c0_10 = arith.constant 0 : index
    %20 = vector.load %arg5[%c0_9, %c0_10] : memref<32x16xbf16, #tpu.memory_space<vmem>>, vector<32x16xbf16>
    %cst_11 = arith.constant dense<0.000000e+00> : vector<8x16xf32>
    %21 = tpu.matmul %17, %20, %cst_11 {dimension_numbers = #tpu.dot_dimension_numbers<[1], [0], [0], [1], [0, 0, 1, 1], [], []>} : vector<8x32xbf16>, vector<32x16xbf16>, vector<8x16xf32> -> vector<8x16xf32>
    %c0_12 = arith.constant 0 : index
    %c0_13 = arith.constant 0 : index
    %22 = vector.load %arg6[%c0_12, %c0_13] : memref<32x16xbf16, #tpu.memory_space<vmem>>, vector<32x16xbf16>
    %cst_14 = arith.constant dense<0.000000e+00> : vector<8x16xf32>
    %23 = tpu.matmul %17, %22, %cst_14 {dimension_numbers = #tpu.dot_dimension_numbers<[1], [0], [0], [1], [0, 0, 1, 1], [], []>} : vector<8x32xbf16>, vector<32x16xbf16>, vector<8x16xf32> -> vector<8x16xf32>
    %24 = arith.truncf %23 : vector<8x16xf32> to vector<8x16xbf16>
    %c0_15 = arith.constant 0 : index
    %c0_16 = arith.constant 0 : index
    %25 = vector.load %arg2[%c0_15, %c0_16] : memref<8x8xf32, #tpu.memory_space<vmem>>, vector<8x4xf32>
    %c0_17 = arith.constant 0 : index
    %c4 = arith.constant 4 : index
    %26 = vector.load %arg2[%c0_17, %c4] : memref<8x8xf32, #tpu.memory_space<vmem>>, vector<8x4xf32>
    %27 = tpu.iota {dimensions = array<i32: 0>} : vector<8x8xi32>
    %28 = tpu.iota {dimensions = array<i32: 1>} : vector<8x8xi32>
    %29 = arith.cmpi sge, %27, %28 : vector<8x8xi32>
    %cst_18 = arith.constant 0.000000e+00 : f32
    %cst_19 = arith.constant -1.000000e+30 : f32
    %30 = vector.broadcast %cst_18 : f32 to vector<8x8xf32>
    %31 = vector.broadcast %cst_19 : f32 to vector<8x8xf32>
    %32 = arith.select %29, %30, %31 : vector<8x8xi1>, vector<8x8xf32>
    %33 = vector.extract_strided_slice %21 {offsets = [0, 0], sizes = [8, 8], strides = [1, 1]} : vector<8x16xf32> to vector<8x8xf32>
    %34 = vector.extract_strided_slice %33 {offsets = [0, 0], sizes = [8, 4], strides = [1, 1]} : vector<8x8xf32> to vector<8x4xf32>
    %35 = vector.extract_strided_slice %33 {offsets = [0, 4], sizes = [8, 4], strides = [1, 1]} : vector<8x8xf32> to vector<8x4xf32>
    %36 = arith.mulf %34, %25 : vector<8x4xf32>
    %37 = arith.mulf %35, %26 : vector<8x4xf32>
    %38 = arith.subf %36, %37 : vector<8x4xf32>
    %39 = arith.mulf %35, %25 : vector<8x4xf32>
    %40 = arith.mulf %34, %26 : vector<8x4xf32>
    %41 = arith.addf %39, %40 : vector<8x4xf32>
    %42 = tpu.concatenate %38, %41 in 1 : vector<8x4xf32>, vector<8x4xf32> -> vector<8x8xf32>
    %43 = arith.truncf %42 : vector<8x8xf32> to vector<8x8xbf16>
    %44 = vector.extract_strided_slice %24 {offsets = [0, 0], sizes = [8, 8], strides = [1, 1]} : vector<8x16xbf16> to vector<8x8xbf16>
    %45 = vector.extract_strided_slice %19 {offsets = [0, 0], sizes = [8, 8], strides = [1, 1]} : vector<8x32xf32> to vector<8x8xf32>
    %46 = vector.extract_strided_slice %45 {offsets = [0, 0], sizes = [8, 4], strides = [1, 1]} : vector<8x8xf32> to vector<8x4xf32>
    %47 = vector.extract_strided_slice %45 {offsets = [0, 4], sizes = [8, 4], strides = [1, 1]} : vector<8x8xf32> to vector<8x4xf32>
    %48 = arith.mulf %46, %25 : vector<8x4xf32>
    %49 = arith.mulf %47, %26 : vector<8x4xf32>
    %50 = arith.subf %48, %49 : vector<8x4xf32>
    %51 = arith.mulf %47, %25 : vector<8x4xf32>
    %52 = arith.mulf %46, %26 : vector<8x4xf32>
    %53 = arith.addf %51, %52 : vector<8x4xf32>
    %54 = tpu.concatenate %50, %53 in 1 : vector<8x4xf32>, vector<8x4xf32> -> vector<8x8xf32>
    %55 = arith.truncf %54 : vector<8x8xf32> to vector<8x8xbf16>
    %cst_20 = arith.constant dense<0.000000e+00> : vector<8x8xf32>
    %56 = tpu.matmul %55, %43, %cst_20 {dimension_numbers = #tpu.dot_dimension_numbers<[1], [1], [0], [0], [0, 0, 1, 0], [], []>} : vector<8x8xbf16>, vector<8x8xbf16>, vector<8x8xf32> -> vector<8x8xf32>
    %cst_21 = arith.constant 0.353553385 : f32
    %57 = vector.broadcast %cst_21 : f32 to vector<8x8xf32>
    %58 = arith.mulf %56, %57 : vector<8x8xf32>
    %59 = arith.addf %58, %32 : vector<8x8xf32>
    %cst_22 = arith.constant dense<0xFF800000> : vector<8xf32>
    %60 = vector.multi_reduction <maximumf>, %59, %cst_22 [1] : vector<8x8xf32> to vector<8xf32>
    %61 = vector.shape_cast %60 : vector<8xf32> to vector<8x1xf32>
    %62 = vector.broadcast %61 : vector<8x1xf32> to vector<8x8xf32>
    %63 = arith.subf %59, %62 : vector<8x8xf32>
    %64 = math.exp %63 : vector<8x8xf32>
    %cst_23 = arith.constant dense<0.000000e+00> : vector<8xf32>
    %65 = vector.multi_reduction <add>, %64, %cst_23 [1] : vector<8x8xf32> to vector<8xf32>
    %66 = vector.shape_cast %65 : vector<8xf32> to vector<8x1xf32>
    %67 = tpu.reciprocal %66 {approx = true} : vector<8x1xf32> -> vector<8x1xf32>
    %68 = vector.broadcast %67 : vector<8x1xf32> to vector<8x8xf32>
    %69 = arith.mulf %64, %68 : vector<8x8xf32>
    %70 = arith.truncf %69 : vector<8x8xf32> to vector<8x8xbf16>
    %cst_24 = arith.constant dense<0.000000e+00> : vector<8x8xf32>
    %71 = tpu.matmul %70, %44, %cst_24 {dimension_numbers = #tpu.dot_dimension_numbers<[1], [0], [0], [1], [0, 0, 1, 1], [], []>} : vector<8x8xbf16>, vector<8x8xbf16>, vector<8x8xf32> -> vector<8x8xf32>
    %72 = arith.truncf %71 : vector<8x8xf32> to vector<8x8xbf16>
    %c0_25 = arith.constant 0 : index
    %c0_26 = arith.constant 0 : index
    %73 = vector.load %arg12[%c0_25, %c0_26] : memref<8x32xbf16, #tpu.memory_space<vmem>>, vector<8x8xbf16>
    tpu.vector_store %arg12[%c0_25, %c0_26], %72 {strides = array<i32>} : memref<8x32xbf16, #tpu.memory_space<vmem>>, vector<8x8xbf16>,
    %74 = vector.extract_strided_slice %19 {offsets = [0, 8], sizes = [8, 8], strides = [1, 1]} : vector<8x32xf32> to vector<8x8xf32>
    %75 = vector.extract_strided_slice %74 {offsets = [0, 0], sizes = [8, 4], strides = [1, 1]} : vector<8x8xf32> to vector<8x4xf32>
    %76 = vector.extract_strided_slice %74 {offsets = [0, 4], sizes = [8, 4], strides = [1, 1]} : vector<8x8xf32> to vector<8x4xf32>
    %77 = arith.mulf %75, %25 : vector<8x4xf32>
    %78 = arith.mulf %76, %26 : vector<8x4xf32>
    %79 = arith.subf %77, %78 : vector<8x4xf32>
    %80 = arith.mulf %76, %25 : vector<8x4xf32>
    %81 = arith.mulf %75, %26 : vector<8x4xf32>
    %82 = arith.addf %80, %81 : vector<8x4xf32>
    %83 = tpu.concatenate %79, %82 in 1 : vector<8x4xf32>, vector<8x4xf32> -> vector<8x8xf32>
    %84 = arith.truncf %83 : vector<8x8xf32> to vector<8x8xbf16>
    %cst_27 = arith.constant dense<0.000000e+00> : vector<8x8xf32>
    %85 = tpu.matmul %84, %43, %cst_27 {dimension_numbers = #tpu.dot_dimension_numbers<[1], [1], [0], [0], [0, 0, 1, 0], [], []>} : vector<8x8xbf16>, vector<8x8xbf16>, vector<8x8xf32> -> vector<8x8xf32>
    %cst_28 = arith.constant 0.353553385 : f32
    %86 = vector.broadcast %cst_28 : f32 to vector<8x8xf32>
    %87 = arith.mulf %85, %86 : vector<8x8xf32>
    %88 = arith.addf %87, %32 : vector<8x8xf32>
    %cst_29 = arith.constant dense<0xFF800000> : vector<8xf32>
    %89 = vector.multi_reduction <maximumf>, %88, %cst_29 [1] : vector<8x8xf32> to vector<8xf32>
    %90 = vector.shape_cast %89 : vector<8xf32> to vector<8x1xf32>
    %91 = vector.broadcast %90 : vector<8x1xf32> to vector<8x8xf32>
    %92 = arith.subf %88, %91 : vector<8x8xf32>
    %93 = math.exp %92 : vector<8x8xf32>
    %cst_30 = arith.constant dense<0.000000e+00> : vector<8xf32>
    %94 = vector.multi_reduction <add>, %93, %cst_30 [1] : vector<8x8xf32> to vector<8xf32>
    %95 = vector.shape_cast %94 : vector<8xf32> to vector<8x1xf32>
    %96 = tpu.reciprocal %95 {approx = true} : vector<8x1xf32> -> vector<8x1xf32>
    %97 = vector.broadcast %96 : vector<8x1xf32> to vector<8x8xf32>
    %98 = arith.mulf %93, %97 : vector<8x8xf32>
    %99 = arith.truncf %98 : vector<8x8xf32> to vector<8x8xbf16>
    %cst_31 = arith.constant dense<0.000000e+00> : vector<8x8xf32>
    %100 = tpu.matmul %99, %44, %cst_31 {dimension_numbers = #tpu.dot_dimension_numbers<[1], [0], [0], [1], [0, 0, 1, 1], [], []>} : vector<8x8xbf16>, vector<8x8xbf16>, vector<8x8xf32> -> vector<8x8xf32>
    %101 = arith.truncf %100 : vector<8x8xf32> to vector<8x8xbf16>
    %c0_32 = arith.constant 0 : index
    %c8 = arith.constant 8 : index
    %102 = vector.load %arg12[%c0_32, %c8] : memref<8x32xbf16, #tpu.memory_space<vmem>>, vector<8x8xbf16>
    tpu.vector_store %arg12[%c0_32, %c8], %101 {strides = array<i32>} : memref<8x32xbf16, #tpu.memory_space<vmem>>, vector<8x8xbf16>,
    %103 = vector.extract_strided_slice %21 {offsets = [0, 8], sizes = [8, 8], strides = [1, 1]} : vector<8x16xf32> to vector<8x8xf32>
    %104 = vector.extract_strided_slice %103 {offsets = [0, 0], sizes = [8, 4], strides = [1, 1]} : vector<8x8xf32> to vector<8x4xf32>
    %105 = vector.extract_strided_slice %103 {offsets = [0, 4], sizes = [8, 4], strides = [1, 1]} : vector<8x8xf32> to vector<8x4xf32>
    %106 = arith.mulf %104, %25 : vector<8x4xf32>
    %107 = arith.mulf %105, %26 : vector<8x4xf32>
    %108 = arith.subf %106, %107 : vector<8x4xf32>
    %109 = arith.mulf %105, %25 : vector<8x4xf32>
    %110 = arith.mulf %104, %26 : vector<8x4xf32>
    %111 = arith.addf %109, %110 : vector<8x4xf32>
    %112 = tpu.concatenate %108, %111 in 1 : vector<8x4xf32>, vector<8x4xf32> -> vector<8x8xf32>
    %113 = arith.truncf %112 : vector<8x8xf32> to vector<8x8xbf16>
    %114 = vector.extract_strided_slice %24 {offsets = [0, 8], sizes = [8, 8], strides = [1, 1]} : vector<8x16xbf16> to vector<8x8xbf16>
    %115 = vector.extract_strided_slice %19 {offsets = [0, 16], sizes = [8, 8], strides = [1, 1]} : vector<8x32xf32> to vector<8x8xf32>
    %116 = vector.extract_strided_slice %115 {offsets = [0, 0], sizes = [8, 4], strides = [1, 1]} : vector<8x8xf32> to vector<8x4xf32>
    %117 = vector.extract_strided_slice %115 {offsets = [0, 4], sizes = [8, 4], strides = [1, 1]} : vector<8x8xf32> to vector<8x4xf32>
    %118 = arith.mulf %116, %25 : vector<8x4xf32>
    %119 = arith.mulf %117, %26 : vector<8x4xf32>
    %120 = arith.subf %118, %119 : vector<8x4xf32>
    %121 = arith.mulf %117, %25 : vector<8x4xf32>
    %122 = arith.mulf %116, %26 : vector<8x4xf32>
    %123 = arith.addf %121, %122 : vector<8x4xf32>
    %124 = tpu.concatenate %120, %123 in 1 : vector<8x4xf32>, vector<8x4xf32> -> vector<8x8xf32>
    %125 = arith.truncf %124 : vector<8x8xf32> to vector<8x8xbf16>
    %cst_33 = arith.constant dense<0.000000e+00> : vector<8x8xf32>
    %126 = tpu.matmul %125, %113, %cst_33 {dimension_numbers = #tpu.dot_dimension_numbers<[1], [1], [0], [0], [0, 0, 1, 0], [], []>} : vector<8x8xbf16>, vector<8x8xbf16>, vector<8x8xf32> -> vector<8x8xf32>
    %cst_34 = arith.constant 0.353553385 : f32
    %127 = vector.broadcast %cst_34 : f32 to vector<8x8xf32>
    %128 = arith.mulf %126, %127 : vector<8x8xf32>
    %129 = arith.addf %128, %32 : vector<8x8xf32>
    %cst_35 = arith.constant dense<0xFF800000> : vector<8xf32>
    %130 = vector.multi_reduction <maximumf>, %129, %cst_35 [1] : vector<8x8xf32> to vector<8xf32>
    %131 = vector.shape_cast %130 : vector<8xf32> to vector<8x1xf32>
    %132 = vector.broadcast %131 : vector<8x1xf32> to vector<8x8xf32>
    %133 = arith.subf %129, %132 : vector<8x8xf32>
    %134 = math.exp %133 : vector<8x8xf32>
    %cst_36 = arith.constant dense<0.000000e+00> : vector<8xf32>
    %135 = vector.multi_reduction <add>, %134, %cst_36 [1] : vector<8x8xf32> to vector<8xf32>
    %136 = vector.shape_cast %135 : vector<8xf32> to vector<8x1xf32>
    %137 = tpu.reciprocal %136 {approx = true} : vector<8x1xf32> -> vector<8x1xf32>
    %138 = vector.broadcast %137 : vector<8x1xf32> to vector<8x8xf32>
    %139 = arith.mulf %134, %138 : vector<8x8xf32>
    %140 = arith.truncf %139 : vector<8x8xf32> to vector<8x8xbf16>
    %cst_37 = arith.constant dense<0.000000e+00> : vector<8x8xf32>
    %141 = tpu.matmul %140, %114, %cst_37 {dimension_numbers = #tpu.dot_dimension_numbers<[1], [0], [0], [1], [0, 0, 1, 1], [], []>} : vector<8x8xbf16>, vector<8x8xbf16>, vector<8x8xf32> -> vector<8x8xf32>
    %142 = arith.truncf %141 : vector<8x8xf32> to vector<8x8xbf16>
    %c0_38 = arith.constant 0 : index
    %c16 = arith.constant 16 : index
    %143 = vector.load %arg12[%c0_38, %c16] : memref<8x32xbf16, #tpu.memory_space<vmem>>, vector<8x8xbf16>
    tpu.vector_store %arg12[%c0_38, %c16], %142 {strides = array<i32>} : memref<8x32xbf16, #tpu.memory_space<vmem>>, vector<8x8xbf16>,
    %144 = vector.extract_strided_slice %19 {offsets = [0, 24], sizes = [8, 8], strides = [1, 1]} : vector<8x32xf32> to vector<8x8xf32>
    %145 = vector.extract_strided_slice %144 {offsets = [0, 0], sizes = [8, 4], strides = [1, 1]} : vector<8x8xf32> to vector<8x4xf32>
    %146 = vector.extract_strided_slice %144 {offsets = [0, 4], sizes = [8, 4], strides = [1, 1]} : vector<8x8xf32> to vector<8x4xf32>
    %147 = arith.mulf %145, %25 : vector<8x4xf32>
    %148 = arith.mulf %146, %26 : vector<8x4xf32>
    %149 = arith.subf %147, %148 : vector<8x4xf32>
    %150 = arith.mulf %146, %25 : vector<8x4xf32>
    %151 = arith.mulf %145, %26 : vector<8x4xf32>
    %152 = arith.addf %150, %151 : vector<8x4xf32>
    %153 = tpu.concatenate %149, %152 in 1 : vector<8x4xf32>, vector<8x4xf32> -> vector<8x8xf32>
    %154 = arith.truncf %153 : vector<8x8xf32> to vector<8x8xbf16>
    %cst_39 = arith.constant dense<0.000000e+00> : vector<8x8xf32>
    %155 = tpu.matmul %154, %113, %cst_39 {dimension_numbers = #tpu.dot_dimension_numbers<[1], [1], [0], [0], [0, 0, 1, 0], [], []>} : vector<8x8xbf16>, vector<8x8xbf16>, vector<8x8xf32> -> vector<8x8xf32>
    %cst_40 = arith.constant 0.353553385 : f32
    %156 = vector.broadcast %cst_40 : f32 to vector<8x8xf32>
    %157 = arith.mulf %155, %156 : vector<8x8xf32>
    %158 = arith.addf %157, %32 : vector<8x8xf32>
    %cst_41 = arith.constant dense<0xFF800000> : vector<8xf32>
    %159 = vector.multi_reduction <maximumf>, %158, %cst_41 [1] : vector<8x8xf32> to vector<8xf32>
    %160 = vector.shape_cast %159 : vector<8xf32> to vector<8x1xf32>
    %161 = vector.broadcast %160 : vector<8x1xf32> to vector<8x8xf32>
    %162 = arith.subf %158, %161 : vector<8x8xf32>
    %163 = math.exp %162 : vector<8x8xf32>
    %cst_42 = arith.constant dense<0.000000e+00> : vector<8xf32>
    %164 = vector.multi_reduction <add>, %163, %cst_42 [1] : vector<8x8xf32> to vector<8xf32>
    %165 = vector.shape_cast %164 : vector<8xf32> to vector<8x1xf32>
    %166 = tpu.reciprocal %165 {approx = true} : vector<8x1xf32> -> vector<8x1xf32>
    %167 = vector.broadcast %166 : vector<8x1xf32> to vector<8x8xf32>
    %168 = arith.mulf %163, %167 : vector<8x8xf32>
    %169 = arith.truncf %168 : vector<8x8xf32> to vector<8x8xbf16>
    %cst_43 = arith.constant dense<0.000000e+00> : vector<8x8xf32>
    %170 = tpu.matmul %169, %114, %cst_43 {dimension_numbers = #tpu.dot_dimension_numbers<[1], [0], [0], [1], [0, 0, 1, 1], [], []>} : vector<8x8xbf16>, vector<8x8xbf16>, vector<8x8xf32> -> vector<8x8xf32>
    %171 = arith.truncf %170 : vector<8x8xf32> to vector<8x8xbf16>
    %c0_44 = arith.constant 0 : index
    %c24 = arith.constant 24 : index
    %172 = vector.load %arg12[%c0_44, %c24] : memref<8x32xbf16, #tpu.memory_space<vmem>>, vector<8x8xbf16>
    tpu.vector_store %arg12[%c0_44, %c24], %171 {strides = array<i32>} : memref<8x32xbf16, #tpu.memory_space<vmem>>, vector<8x8xbf16>,
    %c0_45 = arith.constant 0 : index
    %c0_46 = arith.constant 0 : index
    %173 = vector.load %arg12[%c0_45, %c0_46] : memref<8x32xbf16, #tpu.memory_space<vmem>>, vector<8x32xbf16>
    %c0_47 = arith.constant 0 : index
    %c0_48 = arith.constant 0 : index
    %174 = vector.load %arg7[%c0_47, %c0_48] : memref<32x32xbf16, #tpu.memory_space<vmem>>, vector<32x32xbf16>
    %cst_49 = arith.constant dense<0.000000e+00> : vector<8x32xf32>
    %175 = tpu.matmul %173, %174, %cst_49 {dimension_numbers = #tpu.dot_dimension_numbers<[1], [0], [0], [1], [0, 0, 1, 1], [], []>} : vector<8x32xbf16>, vector<32x32xbf16>, vector<8x32xf32> -> vector<8x32xf32>
    %176 = arith.addf %1, %175 : vector<8x32xf32>
    %177 = arith.mulf %176, %176 : vector<8x32xf32>
    %cst_50 = arith.constant dense<0.000000e+00> : vector<8xf32>
    %178 = vector.multi_reduction <add>, %177, %cst_50 [1] : vector<8x32xf32> to vector<8xf32>
    %179 = vector.shape_cast %178 : vector<8xf32> to vector<8x1xf32>
    %cst_51 = arith.constant 3.200000e+01 : f32
    %180 = vector.broadcast %cst_51 : f32 to vector<8x1xf32>
    %181 = arith.divf %179, %180 : vector<8x1xf32>
    %cst_52 = arith.constant 9.99999997E-7 : f32
    %182 = vector.broadcast %cst_52 : f32 to vector<8x1xf32>
    %183 = arith.addf %181, %182 : vector<8x1xf32>
    %184 = math.rsqrt %183 : vector<8x1xf32>
    %185 = vector.broadcast %184 : vector<8x1xf32> to vector<8x32xf32>
    %186 = arith.mulf %176, %185 : vector<8x32xf32>
    %c0_53 = arith.constant 0 : index
    %c0_54 = arith.constant 0 : index
    %187 = vector.load %arg8[%c0_53, %c0_54] : memref<1x32xf32, #tpu.memory_space<vmem>>, vector<1x32xf32>
    %188 = vector.shape_cast %187 : vector<1x32xf32> to vector<32xf32>
    %189 = vector.shape_cast %188 : vector<32xf32> to vector<1x32xf32>
    %190 = vector.broadcast %189 : vector<1x32xf32> to vector<8x32xf32>
    %191 = arith.mulf %186, %190 : vector<8x32xf32>
    %192 = arith.truncf %191 : vector<8x32xf32> to vector<8x32xbf16>
    %c0_55 = arith.constant 0 : index
    %c0_56 = arith.constant 0 : index
    %193 = vector.load %arg9[%c0_55, %c0_56] : memref<32x128xbf16, #tpu.memory_space<vmem>>, vector<32x128xbf16>
    %cst_57 = arith.constant dense<0.000000e+00> : vector<8x128xf32>
    %194 = tpu.matmul %192, %193, %cst_57 {dimension_numbers = #tpu.dot_dimension_numbers<[1], [0], [0], [1], [0, 0, 1, 1], [], []>} : vector<8x32xbf16>, vector<32x128xbf16>, vector<8x128xf32> -> vector<8x128xf32>
    %195 = vector.extract_strided_slice %194 {offsets = [0, 0], sizes = [8, 64], strides = [1, 1]} : vector<8x128xf32> to vector<8x64xf32>
    %196 = vector.extract_strided_slice %194 {offsets = [0, 64], sizes = [8, 64], strides = [1, 1]} : vector<8x128xf32> to vector<8x64xf32>
    %197 = arith.negf %195 : vector<8x64xf32>
    %198 = math.exp %197 : vector<8x64xf32>
    %cst_58 = arith.constant 1.000000e+00 : f32
    %199 = vector.broadcast %cst_58 : f32 to vector<8x64xf32>
    %200 = arith.addf %199, %198 : vector<8x64xf32>
    %201 = arith.divf %199, %200 : vector<8x64xf32>
    %202 = arith.mulf %195, %201 : vector<8x64xf32>
    %203 = arith.mulf %202, %196 : vector<8x64xf32>
    %204 = arith.truncf %203 : vector<8x64xf32> to vector<8x64xbf16>
    %c0_59 = arith.constant 0 : index
    %c0_60 = arith.constant 0 : index
    %205 = vector.load %arg10[%c0_59, %c0_60] : memref<64x32xbf16, #tpu.memory_space<vmem>>, vector<64x32xbf16>
    %cst_61 = arith.constant dense<0.000000e+00> : vector<8x32xf32>
    %206 = tpu.matmul %204, %205, %cst_61 {dimension_numbers = #tpu.dot_dimension_numbers<[1], [0], [0], [1], [0, 0, 1, 1], [], []>} : vector<8x64xbf16>, vector<64x32xbf16>, vector<8x32xf32> -> vector<8x32xf32>
    %207 = arith.addf %176, %206 : vector<8x32xf32>
    %c0_62 = arith.constant 0 : index
    %c0_63 = arith.constant 0 : index
    %c0_64 = arith.constant 0 : index
    %208 = vector.load %arg11[%c0_62, %c0_63, %c0_64] : memref<1x8x32xf32, #tpu.memory_space<vmem>>, vector<1x8x32xf32>
    %209 = vector.shape_cast %208 : vector<1x8x32xf32> to vector<8x32xf32>
    %210 = vector.shape_cast %207 : vector<8x32xf32> to vector<1x8x32xf32>
    tpu.vector_store %arg11[%c0_62, %c0_63, %c0_64], %210 {strides = array<i32>} : memref<1x8x32xf32, #tpu.memory_space<vmem>>, vector<1x8x32xf32>,
    return
  }
  func.func @transform_0(%arg0: i32) -> (i32, i32, i32) {
    %c0_i32 = arith.constant 0 : i32
    %c0_i32_0 = arith.constant 0 : i32
    %c0_i32_1 = arith.constant 0 : i32
    return %arg0, %c0_i32, %c0_i32_0 : i32, i32, i32
  }
  func.func @transform_1(%arg0: i32) -> (i32, i32) {
    %c0_i32 = arith.constant 0 : i32
    %c0_i32_0 = arith.constant 0 : i32
    %c0_i32_1 = arith.constant 0 : i32
    return %c0_i32, %c0_i32_0 : i32, i32
  }
  func.func @transform_2(%arg0: i32) -> (i32, i32) {
    %c0_i32 = arith.constant 0 : i32
    %c0_i32_0 = arith.constant 0 : i32
    %c0_i32_1 = arith.constant 0 : i32
    return %c0_i32, %c0_i32_0 : i32, i32
  }
  func.func @transform_3(%arg0: i32) -> (i32, i32) {
    %c0_i32 = arith.constant 0 : i32
    %c0_i32_0 = arith.constant 0 : i32
    %c0_i32_1 = arith.constant 0 : i32
    return %c0_i32, %c0_i32_0 : i32, i32
  }
  func.func @transform_4(%arg0: i32) -> (i32, i32) {
    %c0_i32 = arith.constant 0 : i32
    %c0_i32_0 = arith.constant 0 : i32
    %c0_i32_1 = arith.constant 0 : i32
    return %c0_i32, %c0_i32_0 : i32, i32
  }
  func.func @transform_5(%arg0: i32) -> (i32, i32) {
    %c0_i32 = arith.constant 0 : i32
    %c0_i32_0 = arith.constant 0 : i32
    %c0_i32_1 = arith.constant 0 : i32
    return %c0_i32, %c0_i32_0 : i32, i32
  }
  func.func @transform_6(%arg0: i32) -> (i32, i32) {
    %c0_i32 = arith.constant 0 : i32
    %c0_i32_0 = arith.constant 0 : i32
    %c0_i32_1 = arith.constant 0 : i32
    return %c0_i32, %c0_i32_0 : i32, i32
  }
  func.func @transform_7(%arg0: i32) -> (i32, i32) {
    %c0_i32 = arith.constant 0 : i32
    %c0_i32_0 = arith.constant 0 : i32
    %c0_i32_1 = arith.constant 0 : i32
    return %c0_i32, %c0_i32_0 : i32, i32
  }
  func.func @transform_8(%arg0: i32) -> (i32, i32) {
    %c0_i32 = arith.constant 0 : i32
    %c0_i32_0 = arith.constant 0 : i32
    %c0_i32_1 = arith.constant 0 : i32
    return %c0_i32, %c0_i32_0 : i32, i32
  }
  func.func @transform_9(%arg0: i32) -> (i32, i32) {
    %c0_i32 = arith.constant 0 : i32
    %c0_i32_0 = arith.constant 0 : i32
    %c0_i32_1 = arith.constant 0 : i32
    return %c0_i32, %c0_i32_0 : i32, i32
  }
  func.func @transform_10(%arg0: i32) -> (i32, i32, i32) {
    %c0_i32 = arith.constant 0 : i32
    %c0_i32_0 = arith.constant 0 : i32
    %c0_i32_1 = arith.constant 0 : i32
    return %arg0, %c0_i32, %c0_i32_0 : i32, i32, i32
  }
}

module attributes {stable_mosaic.version = 11 : i64} {
  func.func @kernel(%arg0: i32, %arg1: memref<1x8x32xf32, #tpu.memory_space<vmem>>, %arg2: memref<8x8xf32, #tpu.memory_space<vmem>>, %arg3: memref<1x32xf32, #tpu.memory_space<vmem>>, %arg4: memref<32x32xbf16, #tpu.memory_space<vmem>>, %arg5: memref<32x16xbf16, #tpu.memory_space<vmem>>, %arg6: memref<32x16xbf16, #tpu.memory_space<vmem>>, %arg7: memref<32x32xbf16, #tpu.memory_space<vmem>>, %arg8: memref<1x32xf32, #tpu.memory_space<vmem>>, %arg9: memref<32x128xbf16, #tpu.memory_space<vmem>>, %arg10: memref<64x32xbf16, #tpu.memory_space<vmem>>, %arg11: memref<1x8x32xf32, #tpu.memory_space<vmem>>, %arg12: memref<8x32xbf16, #tpu.memory_space<vmem>>) attributes {dimension_semantics = [#tpu.dimension_semantics<parallel>], iteration_bounds = array<i64: 2>, scalar_prefetch = 0 : i64, scratch_operands = 1 : i64, tpu.core_type = #tpu.core_type<tc>, window_params = [{transform_indices = @transform_0, window_bounds = array<i64: 1, 8, 32>}, {pipeline_mode = #tpu.pipeline_mode<synchronous>, transform_indices = @transform_1, window_bounds = array<i64: 8, 8>}, {pipeline_mode = #tpu.pipeline_mode<synchronous>, transform_indices = @transform_2, window_bounds = array<i64: 1, 32>}, {pipeline_mode = #tpu.pipeline_mode<synchronous>, transform_indices = @transform_3, window_bounds = array<i64: 32, 32>}, {pipeline_mode = #tpu.pipeline_mode<synchronous>, transform_indices = @transform_4, window_bounds = array<i64: 32, 16>}, {pipeline_mode = #tpu.pipeline_mode<synchronous>, transform_indices = @transform_5, window_bounds = array<i64: 32, 16>}, {pipeline_mode = #tpu.pipeline_mode<synchronous>, transform_indices = @transform_6, window_bounds = array<i64: 32, 32>}, {pipeline_mode = #tpu.pipeline_mode<synchronous>, transform_indices = @transform_7, window_bounds = array<i64: 1, 32>}, {pipeline_mode = #tpu.pipeline_mode<synchronous>, transform_indices = @transform_8, window_bounds = array<i64: 32, 128>}, {pipeline_mode = #tpu.pipeline_mode<synchronous>, transform_indices = @transform_9, window_bounds = array<i64: 64, 32>}, {transform_indices = @transform_10, window_bounds = array<i64: 1, 8, 32>}]} {
    %c0 = arith.constant 0 : index
    %c0_0 = arith.constant 0 : index
    %c0_1 = arith.constant 0 : index
    %0 = vector.load %arg1[%c0, %c0_0, %c0_1] : memref<1x8x32xf32, #tpu.memory_space<vmem>>, vector<1x8x32xf32>
    %1 = vector.shape_cast %0 : vector<1x8x32xf32> to vector<8x32xf32>
    %2 = arith.mulf %1, %1 : vector<8x32xf32>
    %cst = arith.constant dense<0.000000e+00> : vector<8xf32>
    %3 = vector.multi_reduction <add>, %2, %cst [1] : vector<8x32xf32> to vector<8xf32>
    %4 = vector.shape_cast %3 : vector<8xf32> to vector<8x1xf32>
    %cst_2 = arith.constant 3.200000e+01 : f32
    %5 = vector.broadcast %cst_2 : f32 to vector<8x1xf32>
    %6 = arith.divf %4, %5 : vector<8x1xf32>
    %cst_3 = arith.constant 9.99999997E-7 : f32
    %7 = vector.broadcast %cst_3 : f32 to vector<8x1xf32>
    %8 = arith.addf %6, %7 : vector<8x1xf32>
    %9 = math.rsqrt %8 : vector<8x1xf32>
    %10 = vector.broadcast %9 : vector<8x1xf32> to vector<8x32xf32>
    %11 = arith.mulf %1, %10 : vector<8x32xf32>
    %c0_4 = arith.constant 0 : index
    %c0_5 = arith.constant 0 : index
    %12 = vector.load %arg3[%c0_4, %c0_5] : memref<1x32xf32, #tpu.memory_space<vmem>>, vector<1x32xf32>
    %13 = vector.shape_cast %12 : vector<1x32xf32> to vector<32xf32>
    %14 = vector.shape_cast %13 : vector<32xf32> to vector<1x32xf32>
    %15 = vector.broadcast %14 : vector<1x32xf32> to vector<8x32xf32>
    %16 = arith.mulf %11, %15 : vector<8x32xf32>
    %17 = arith.truncf %16 : vector<8x32xf32> to vector<8x32xbf16>
    %c0_6 = arith.constant 0 : index
    %c0_7 = arith.constant 0 : index
    %18 = vector.load %arg4[%c0_6, %c0_7] : memref<32x32xbf16, #tpu.memory_space<vmem>>, vector<32x32xbf16>
    %cst_8 = arith.constant dense<0.000000e+00> : vector<8x32xf32>
    %19 = tpu.matmul %17, %18, %cst_8 {dimension_numbers = #tpu.dot_dimension_numbers<[1], [0], [0], [1], [0, 0, 1, 1], [], []>} : vector<8x32xbf16>, vector<32x32xbf16>, vector<8x32xf32> -> vector<8x32xf32>
    %c0_9 = arith.constant 0 : index
    %c0_10 = arith.constant 0 : index
    %20 = vector.load %arg5[%c0_9, %c0_10] : memref<32x16xbf16, #tpu.memory_space<vmem>>, vector<32x16xbf16>
    %cst_11 = arith.constant dense<0.000000e+00> : vector<8x16xf32>
    %21 = tpu.matmul %17, %20, %cst_11 {dimension_numbers = #tpu.dot_dimension_numbers<[1], [0], [0], [1], [0, 0, 1, 1], [], []>} : vector<8x32xbf16>, vector<32x16xbf16>, vector<8x16xf32> -> vector<8x16xf32>
    %c0_12 = arith.constant 0 : index
    %c0_13 = arith.constant 0 : index
    %22 = vector.load %arg6[%c0_12, %c0_13] : memref<32x16xbf16, #tpu.memory_space<vmem>>, vector<32x16xbf16>
    %cst_14 = arith.constant dense<0.000000e+00> : vector<8x16xf32>
    %23 = tpu.matmul %17, %22, %cst_14 {dimension_numbers = #tpu.dot_dimension_numbers<[1], [0], [0], [1], [0, 0, 1, 1], [], []>} : vector<8x32xbf16>, vector<32x16xbf16>, vector<8x16xf32> -> vector<8x16xf32>
    %24 = arith.truncf %23 : vector<8x16xf32> to vector<8x16xbf16>
    %c0_15 = arith.constant 0 : index
    %c0_16 = arith.constant 0 : index
    %25 = vector.load %arg2[%c0_15, %c0_16] : memref<8x8xf32, #tpu.memory_space<vmem>>, vector<8x4xf32>
    %c0_17 = arith.constant 0 : index
    %c4 = arith.constant 4 : index
    %26 = vector.load %arg2[%c0_17, %c4] : memref<8x8xf32, #tpu.memory_space<vmem>>, vector<8x4xf32>
    %27 = tpu.iota {dimensions = array<i32: 0>} : vector<8x8xi32>
    %28 = tpu.iota {dimensions = array<i32: 1>} : vector<8x8xi32>
    %29 = arith.cmpi sge, %27, %28 : vector<8x8xi32>
    %cst_18 = arith.constant 0.000000e+00 : f32
    %cst_19 = arith.constant -1.000000e+30 : f32
    %30 = vector.broadcast %cst_18 : f32 to vector<8x8xf32>
    %31 = vector.broadcast %cst_19 : f32 to vector<8x8xf32>
    %32 = arith.select %29, %30, %31 : vector<8x8xi1>, vector<8x8xf32>
    %33 = vector.extract_strided_slice %21 {offsets = [0, 0], sizes = [8, 8], strides = [1, 1]} : vector<8x16xf32> to vector<8x8xf32>
    %34 = vector.extract_strided_slice %33 {offsets = [0, 0], sizes = [8, 4], strides = [1, 1]} : vector<8x8xf32> to vector<8x4xf32>
    %35 = vector.extract_strided_slice %33 {offsets = [0, 4], sizes = [8, 4], strides = [1, 1]} : vector<8x8xf32> to vector<8x4xf32>
    %36 = arith.mulf %34, %25 : vector<8x4xf32>
    %37 = arith.mulf %35, %26 : vector<8x4xf32>
    %38 = arith.subf %36, %37 : vector<8x4xf32>
    %39 = arith.mulf %35, %25 : vector<8x4xf32>
    %40 = arith.mulf %34, %26 : vector<8x4xf32>
    %41 = arith.addf %39, %40 : vector<8x4xf32>
    %42 = tpu.concatenate %38, %41 in 1 : vector<8x4xf32>, vector<8x4xf32> -> vector<8x8xf32>
    %43 = arith.truncf %42 : vector<8x8xf32> to vector<8x8xbf16>
    %44 = vector.extract_strided_slice %24 {offsets = [0, 0], sizes = [8, 8], strides = [1, 1]} : vector<8x16xbf16> to vector<8x8xbf16>
    %45 = vector.extract_strided_slice %19 {offsets = [0, 0], sizes = [8, 8], strides = [1, 1]} : vector<8x32xf32> to vector<8x8xf32>
    %46 = vector.extract_strided_slice %45 {offsets = [0, 0], sizes = [8, 4], strides = [1, 1]} : vector<8x8xf32> to vector<8x4xf32>
    %47 = vector.extract_strided_slice %45 {offsets = [0, 4], sizes = [8, 4], strides = [1, 1]} : vector<8x8xf32> to vector<8x4xf32>
    %48 = arith.mulf %46, %25 : vector<8x4xf32>
    %49 = arith.mulf %47, %26 : vector<8x4xf32>
    %50 = arith.subf %48, %49 : vector<8x4xf32>
    %51 = arith.mulf %47, %25 : vector<8x4xf32>
    %52 = arith.mulf %46, %26 : vector<8x4xf32>
    %53 = arith.addf %51, %52 : vector<8x4xf32>
    %54 = tpu.concatenate %50, %53 in 1 : vector<8x4xf32>, vector<8x4xf32> -> vector<8x8xf32>
    %55 = arith.truncf %54 : vector<8x8xf32> to vector<8x8xbf16>
    %cst_20 = arith.constant dense<0.000000e+00> : vector<8x8xf32>
    %56 = tpu.matmul %55, %43, %cst_20 {dimension_numbers = #tpu.dot_dimension_numbers<[1], [1], [0], [0], [0, 0, 1, 0], [], []>} : vector<8x8xbf16>, vector<8x8xbf16>, vector<8x8xf32> -> vector<8x8xf32>
    %cst_21 = arith.constant 0.353553385 : f32
    %57 = vector.broadcast %cst_21 : f32 to vector<8x8xf32>
    %58 = arith.mulf %56, %57 : vector<8x8xf32>
    %59 = arith.addf %58, %32 : vector<8x8xf32>
    %cst_22 = arith.constant dense<0xFF800000> : vector<8xf32>
    %60 = vector.multi_reduction <maximumf>, %59, %cst_22 [1] : vector<8x8xf32> to vector<8xf32>
    %61 = vector.shape_cast %60 : vector<8xf32> to vector<8x1xf32>
    %62 = vector.broadcast %61 : vector<8x1xf32> to vector<8x8xf32>
    %63 = arith.subf %59, %62 : vector<8x8xf32>
    %64 = math.exp %63 : vector<8x8xf32>
    %cst_23 = arith.constant dense<0.000000e+00> : vector<8xf32>
    %65 = vector.multi_reduction <add>, %64, %cst_23 [1] : vector<8x8xf32> to vector<8xf32>
    %66 = vector.shape_cast %65 : vector<8xf32> to vector<8x1xf32>
    %67 = tpu.reciprocal %66 {approx = true} : vector<8x1xf32> -> vector<8x1xf32>
    %68 = vector.broadcast %67 : vector<8x1xf32> to vector<8x8xf32>
    %69 = arith.mulf %64, %68 : vector<8x8xf32>
    %70 = arith.truncf %69 : vector<8x8xf32> to vector<8x8xbf16>
    %cst_24 = arith.constant dense<0.000000e+00> : vector<8x8xf32>
    %71 = tpu.matmul %70, %44, %cst_24 {dimension_numbers = #tpu.dot_dimension_numbers<[1], [0], [0], [1], [0, 0, 1, 1], [], []>} : vector<8x8xbf16>, vector<8x8xbf16>, vector<8x8xf32> -> vector<8x8xf32>
    %72 = arith.truncf %71 : vector<8x8xf32> to vector<8x8xbf16>
    %c0_25 = arith.constant 0 : index
    %c0_26 = arith.constant 0 : index
    %73 = vector.load %arg12[%c0_25, %c0_26] : memref<8x32xbf16, #tpu.memory_space<vmem>>, vector<8x8xbf16>
    tpu.vector_store %arg12[%c0_25, %c0_26], %72 {strides = array<i32>} : memref<8x32xbf16, #tpu.memory_space<vmem>>, vector<8x8xbf16>,
    %74 = vector.extract_strided_slice %19 {offsets = [0, 8], sizes = [8, 8], strides = [1, 1]} : vector<8x32xf32> to vector<8x8xf32>
    %75 = vector.extract_strided_slice %74 {offsets = [0, 0], sizes = [8, 4], strides = [1, 1]} : vector<8x8xf32> to vector<8x4xf32>
    %76 = vector.extract_strided_slice %74 {offsets = [0, 4], sizes = [8, 4], strides = [1, 1]} : vector<8x8xf32> to vector<8x4xf32>
    %77 = arith.mulf %75, %25 : vector<8x4xf32>
    %78 = arith.mulf %76, %26 : vector<8x4xf32>
    %79 = arith.subf %77, %78 : vector<8x4xf32>
    %80 = arith.mulf %76, %25 : vector<8x4xf32>
    %81 = arith.mulf %75, %26 : vector<8x4xf32>
    %82 = arith.addf %80, %81 : vector<8x4xf32>
    %83 = tpu.concatenate %79, %82 in 1 : vector<8x4xf32>, vector<8x4xf32> -> vector<8x8xf32>
    %84 = arith.truncf %83 : vector<8x8xf32> to vector<8x8xbf16>
    %cst_27 = arith.constant dense<0.000000e+00> : vector<8x8xf32>
    %85 = tpu.matmul %84, %43, %cst_27 {dimension_numbers = #tpu.dot_dimension_numbers<[1], [1], [0], [0], [0, 0, 1, 0], [], []>} : vector<8x8xbf16>, vector<8x8xbf16>, vector<8x8xf32> -> vector<8x8xf32>
    %cst_28 = arith.constant 0.353553385 : f32
    %86 = vector.broadcast %cst_28 : f32 to vector<8x8xf32>
    %87 = arith.mulf %85, %86 : vector<8x8xf32>
    %88 = arith.addf %87, %32 : vector<8x8xf32>
    %cst_29 = arith.constant dense<0xFF800000> : vector<8xf32>
    %89 = vector.multi_reduction <maximumf>, %88, %cst_29 [1] : vector<8x8xf32> to vector<8xf32>
    %90 = vector.shape_cast %89 : vector<8xf32> to vector<8x1xf32>
    %91 = vector.broadcast %90 : vector<8x1xf32> to vector<8x8xf32>
    %92 = arith.subf %88, %91 : vector<8x8xf32>
    %93 = math.exp %92 : vector<8x8xf32>
    %cst_30 = arith.constant dense<0.000000e+00> : vector<8xf32>
    %94 = vector.multi_reduction <add>, %93, %cst_30 [1] : vector<8x8xf32> to vector<8xf32>
    %95 = vector.shape_cast %94 : vector<8xf32> to vector<8x1xf32>
    %96 = tpu.reciprocal %95 {approx = true} : vector<8x1xf32> -> vector<8x1xf32>
    %97 = vector.broadcast %96 : vector<8x1xf32> to vector<8x8xf32>
    %98 = arith.mulf %93, %97 : vector<8x8xf32>
    %99 = arith.truncf %98 : vector<8x8xf32> to vector<8x8xbf16>
    %cst_31 = arith.constant dense<0.000000e+00> : vector<8x8xf32>
    %100 = tpu.matmul %99, %44, %cst_31 {dimension_numbers = #tpu.dot_dimension_numbers<[1], [0], [0], [1], [0, 0, 1, 1], [], []>} : vector<8x8xbf16>, vector<8x8xbf16>, vector<8x8xf32> -> vector<8x8xf32>
    %101 = arith.truncf %100 : vector<8x8xf32> to vector<8x8xbf16>
    %c0_32 = arith.constant 0 : index
    %c8 = arith.constant 8 : index
    %102 = vector.load %arg12[%c0_32, %c8] : memref<8x32xbf16, #tpu.memory_space<vmem>>, vector<8x8xbf16>
    tpu.vector_store %arg12[%c0_32, %c8], %101 {strides = array<i32>} : memref<8x32xbf16, #tpu.memory_space<vmem>>, vector<8x8xbf16>,
    %103 = vector.extract_strided_slice %21 {offsets = [0, 8], sizes = [8, 8], strides = [1, 1]} : vector<8x16xf32> to vector<8x8xf32>
    %104 = vector.extract_strided_slice %103 {offsets = [0, 0], sizes = [8, 4], strides = [1, 1]} : vector<8x8xf32> to vector<8x4xf32>
    %105 = vector.extract_strided_slice %103 {offsets = [0, 4], sizes = [8, 4], strides = [1, 1]} : vector<8x8xf32> to vector<8x4xf32>
    %106 = arith.mulf %104, %25 : vector<8x4xf32>
    %107 = arith.mulf %105, %26 : vector<8x4xf32>
    %108 = arith.subf %106, %107 : vector<8x4xf32>
    %109 = arith.mulf %105, %25 : vector<8x4xf32>
    %110 = arith.mulf %104, %26 : vector<8x4xf32>
    %111 = arith.addf %109, %110 : vector<8x4xf32>
    %112 = tpu.concatenate %108, %111 in 1 : vector<8x4xf32>, vector<8x4xf32> -> vector<8x8xf32>
    %113 = arith.truncf %112 : vector<8x8xf32> to vector<8x8xbf16>
    %114 = vector.extract_strided_slice %24 {offsets = [0, 8], sizes = [8, 8], strides = [1, 1]} : vector<8x16xbf16> to vector<8x8xbf16>
    %115 = vector.extract_strided_slice %19 {offsets = [0, 16], sizes = [8, 8], strides = [1, 1]} : vector<8x32xf32> to vector<8x8xf32>
    %116 = vector.extract_strided_slice %115 {offsets = [0, 0], sizes = [8, 4], strides = [1, 1]} : vector<8x8xf32> to vector<8x4xf32>
    %117 = vector.extract_strided_slice %115 {offsets = [0, 4], sizes = [8, 4], strides = [1, 1]} : vector<8x8xf32> to vector<8x4xf32>
    %118 = arith.mulf %116, %25 : vector<8x4xf32>
    %119 = arith.mulf %117, %26 : vector<8x4xf32>
    %120 = arith.subf %118, %119 : vector<8x4xf32>
    %121 = arith.mulf %117, %25 : vector<8x4xf32>
    %122 = arith.mulf %116, %26 : vector<8x4xf32>
    %123 = arith.addf %121, %122 : vector<8x4xf32>
    %124 = tpu.concatenate %120, %123 in 1 : vector<8x4xf32>, vector<8x4xf32> -> vector<8x8xf32>
    %125 = arith.truncf %124 : vector<8x8xf32> to vector<8x8xbf16>
    %cst_33 = arith.constant dense<0.000000e+00> : vector<8x8xf32>
    %126 = tpu.matmul %125, %113, %cst_33 {dimension_numbers = #tpu.dot_dimension_numbers<[1], [1], [0], [0], [0, 0, 1, 0], [], []>} : vector<8x8xbf16>, vector<8x8xbf16>, vector<8x8xf32> -> vector<8x8xf32>
    %cst_34 = arith.constant 0.353553385 : f32
    %127 = vector.broadcast %cst_34 : f32 to vector<8x8xf32>
    %128 = arith.mulf %126, %127 : vector<8x8xf32>
    %129 = arith.addf %128, %32 : vector<8x8xf32>
    %cst_35 = arith.constant dense<0xFF800000> : vector<8xf32>
    %130 = vector.multi_reduction <maximumf>, %129, %cst_35 [1] : vector<8x8xf32> to vector<8xf32>
    %131 = vector.shape_cast %130 : vector<8xf32> to vector<8x1xf32>
    %132 = vector.broadcast %131 : vector<8x1xf32> to vector<8x8xf32>
    %133 = arith.subf %129, %132 : vector<8x8xf32>
    %134 = math.exp %133 : vector<8x8xf32>
    %cst_36 = arith.constant dense<0.000000e+00> : vector<8xf32>
    %135 = vector.multi_reduction <add>, %134, %cst_36 [1] : vector<8x8xf32> to vector<8xf32>
    %136 = vector.shape_cast %135 : vector<8xf32> to vector<8x1xf32>
    %137 = tpu.reciprocal %136 {approx = true} : vector<8x1xf32> -> vector<8x1xf32>
    %138 = vector.broadcast %137 : vector<8x1xf32> to vector<8x8xf32>
    %139 = arith.mulf %134, %138 : vector<8x8xf32>
    %140 = arith.truncf %139 : vector<8x8xf32> to vector<8x8xbf16>
    %cst_37 = arith.constant dense<0.000000e+00> : vector<8x8xf32>
    %141 = tpu.matmul %140, %114, %cst_37 {dimension_numbers = #tpu.dot_dimension_numbers<[1], [0], [0], [1], [0, 0, 1, 1], [], []>} : vector<8x8xbf16>, vector<8x8xbf16>, vector<8x8xf32> -> vector<8x8xf32>
    %142 = arith.truncf %141 : vector<8x8xf32> to vector<8x8xbf16>
    %c0_38 = arith.constant 0 : index
    %c16 = arith.constant 16 : index
    %143 = vector.load %arg12[%c0_38, %c16] : memref<8x32xbf16, #tpu.memory_space<vmem>>, vector<8x8xbf16>
    tpu.vector_store %arg12[%c0_38, %c16], %142 {strides = array<i32>} : memref<8x32xbf16, #tpu.memory_space<vmem>>, vector<8x8xbf16>,
    %144 = vector.extract_strided_slice %19 {offsets = [0, 24], sizes = [8, 8], strides = [1, 1]} : vector<8x32xf32> to vector<8x8xf32>
    %145 = vector.extract_strided_slice %144 {offsets = [0, 0], sizes = [8, 4], strides = [1, 1]} : vector<8x8xf32> to vector<8x4xf32>
    %146 = vector.extract_strided_slice %144 {offsets = [0, 4], sizes = [8, 4], strides = [1, 1]} : vector<8x8xf32> to vector<8x4xf32>
    %147 = arith.mulf %145, %25 : vector<8x4xf32>
    %148 = arith.mulf %146, %26 : vector<8x4xf32>
    %149 = arith.subf %147, %148 : vector<8x4xf32>
    %150 = arith.mulf %146, %25 : vector<8x4xf32>
    %151 = arith.mulf %145, %26 : vector<8x4xf32>
    %152 = arith.addf %150, %151 : vector<8x4xf32>
    %153 = tpu.concatenate %149, %152 in 1 : vector<8x4xf32>, vector<8x4xf32> -> vector<8x8xf32>
    %154 = arith.truncf %153 : vector<8x8xf32> to vector<8x8xbf16>
    %cst_39 = arith.constant dense<0.000000e+00> : vector<8x8xf32>
    %155 = tpu.matmul %154, %113, %cst_39 {dimension_numbers = #tpu.dot_dimension_numbers<[1], [1], [0], [0], [0, 0, 1, 0], [], []>} : vector<8x8xbf16>, vector<8x8xbf16>, vector<8x8xf32> -> vector<8x8xf32>
    %cst_40 = arith.constant 0.353553385 : f32
    %156 = vector.broadcast %cst_40 : f32 to vector<8x8xf32>
    %157 = arith.mulf %155, %156 : vector<8x8xf32>
    %158 = arith.addf %157, %32 : vector<8x8xf32>
    %cst_41 = arith.constant dense<0xFF800000> : vector<8xf32>
    %159 = vector.multi_reduction <maximumf>, %158, %cst_41 [1] : vector<8x8xf32> to vector<8xf32>
    %160 = vector.shape_cast %159 : vector<8xf32> to vector<8x1xf32>
    %161 = vector.broadcast %160 : vector<8x1xf32> to vector<8x8xf32>
    %162 = arith.subf %158, %161 : vector<8x8xf32>
    %163 = math.exp %162 : vector<8x8xf32>
    %cst_42 = arith.constant dense<0.000000e+00> : vector<8xf32>
    %164 = vector.multi_reduction <add>, %163, %cst_42 [1] : vector<8x8xf32> to vector<8xf32>
    %165 = vector.shape_cast %164 : vector<8xf32> to vector<8x1xf32>
    %166 = tpu.reciprocal %165 {approx = true} : vector<8x1xf32> -> vector<8x1xf32>
    %167 = vector.broadcast %166 : vector<8x1xf32> to vector<8x8xf32>
    %168 = arith.mulf %163, %167 : vector<8x8xf32>
    %169 = arith.truncf %168 : vector<8x8xf32> to vector<8x8xbf16>
    %cst_43 = arith.constant dense<0.000000e+00> : vector<8x8xf32>
    %170 = tpu.matmul %169, %114, %cst_43 {dimension_numbers = #tpu.dot_dimension_numbers<[1], [0], [0], [1], [0, 0, 1, 1], [], []>} : vector<8x8xbf16>, vector<8x8xbf16>, vector<8x8xf32> -> vector<8x8xf32>
    %171 = arith.truncf %170 : vector<8x8xf32> to vector<8x8xbf16>
    %c0_44 = arith.constant 0 : index
    %c24 = arith.constant 24 : index
    %172 = vector.load %arg12[%c0_44, %c24] : memref<8x32xbf16, #tpu.memory_space<vmem>>, vector<8x8xbf16>
    tpu.vector_store %arg12[%c0_44, %c24], %171 {strides = array<i32>} : memref<8x32xbf16, #tpu.memory_space<vmem>>, vector<8x8xbf16>,
    %c0_45 = arith.constant 0 : index
    %c0_46 = arith.constant 0 : index
    %173 = vector.load %arg12[%c0_45, %c0_46] : memref<8x32xbf16, #tpu.memory_space<vmem>>, vector<8x32xbf16>
    %c0_47 = arith.constant 0 : index
    %c0_48 = arith.constant 0 : index
    %174 = vector.load %arg7[%c0_47, %c0_48] : memref<32x32xbf16, #tpu.memory_space<vmem>>, vector<32x32xbf16>
    %cst_49 = arith.constant dense<0.000000e+00> : vector<8x32xf32>
    %175 = tpu.matmul %173, %174, %cst_49 {dimension_numbers = #tpu.dot_dimension_numbers<[1], [0], [0], [1], [0, 0, 1, 1], [], []>} : vector<8x32xbf16>, vector<32x32xbf16>, vector<8x32xf32> -> vector<8x32xf32>
    %176 = arith.addf %1, %175 : vector<8x32xf32>
    %177 = arith.mulf %176, %176 : vector<8x32xf32>
    %cst_50 = arith.constant dense<0.000000e+00> : vector<8xf32>
    %178 = vector.multi_reduction <add>, %177, %cst_50 [1] : vector<8x32xf32> to vector<8xf32>
    %179 = vector.shape_cast %178 : vector<8xf32> to vector<8x1xf32>
    %cst_51 = arith.constant 3.200000e+01 : f32
    %180 = vector.broadcast %cst_51 : f32 to vector<8x1xf32>
    %181 = arith.divf %179, %180 : vector<8x1xf32>
    %cst_52 = arith.constant 9.99999997E-7 : f32
    %182 = vector.broadcast %cst_52 : f32 to vector<8x1xf32>
    %183 = arith.addf %181, %182 : vector<8x1xf32>
    %184 = math.rsqrt %183 : vector<8x1xf32>
    %185 = vector.broadcast %184 : vector<8x1xf32> to vector<8x32xf32>
    %186 = arith.mulf %176, %185 : vector<8x32xf32>
    %c0_53 = arith.constant 0 : index
    %c0_54 = arith.constant 0 : index
    %187 = vector.load %arg8[%c0_53, %c0_54] : memref<1x32xf32, #tpu.memory_space<vmem>>, vector<1x32xf32>
    %188 = vector.shape_cast %187 : vector<1x32xf32> to vector<32xf32>
    %189 = vector.shape_cast %188 : vector<32xf32> to vector<1x32xf32>
    %190 = vector.broadcast %189 : vector<1x32xf32> to vector<8x32xf32>
    %191 = arith.mulf %186, %190 : vector<8x32xf32>
    %192 = arith.truncf %191 : vector<8x32xf32> to vector<8x32xbf16>
    %c0_55 = arith.constant 0 : index
    %c0_56 = arith.constant 0 : index
    %193 = vector.load %arg9[%c0_55, %c0_56] : memref<32x128xbf16, #tpu.memory_space<vmem>>, vector<32x128xbf16>
    %cst_57 = arith.constant dense<0.000000e+00> : vector<8x128xf32>
    %194 = tpu.matmul %192, %193, %cst_57 {dimension_numbers = #tpu.dot_dimension_numbers<[1], [0], [0], [1], [0, 0, 1, 1], [], []>} : vector<8x32xbf16>, vector<32x128xbf16>, vector<8x128xf32> -> vector<8x128xf32>
    %195 = vector.extract_strided_slice %194 {offsets = [0, 0], sizes = [8, 64], strides = [1, 1]} : vector<8x128xf32> to vector<8x64xf32>
    %196 = vector.extract_strided_slice %194 {offsets = [0, 64], sizes = [8, 64], strides = [1, 1]} : vector<8x128xf32> to vector<8x64xf32>
    %197 = arith.negf %195 : vector<8x64xf32>
    %198 = math.exp %197 : vector<8x64xf32>
    %cst_58 = arith.constant 1.000000e+00 : f32
    %199 = vector.broadcast %cst_58 : f32 to vector<8x64xf32>
    %200 = arith.addf %199, %198 : vector<8x64xf32>
    %201 = arith.divf %199, %200 : vector<8x64xf32>
    %202 = arith.mulf %195, %201 : vector<8x64xf32>
    %203 = arith.mulf %202, %196 : vector<8x64xf32>
    %204 = arith.truncf %203 : vector<8x64xf32> to vector<8x64xbf16>
    %c0_59 = arith.constant 0 : index
    %c0_60 = arith.constant 0 : index
    %205 = vector.load %arg10[%c0_59, %c0_60] : memref<64x32xbf16, #tpu.memory_space<vmem>>, vector<64x32xbf16>
    %cst_61 = arith.constant dense<0.000000e+00> : vector<8x32xf32>
    %206 = tpu.matmul %204, %205, %cst_61 {dimension_numbers = #tpu.dot_dimension_numbers<[1], [0], [0], [1], [0, 0, 1, 1], [], []>} : vector<8x64xbf16>, vector<64x32xbf16>, vector<8x32xf32> -> vector<8x32xf32>
    %207 = arith.addf %176, %206 : vector<8x32xf32>
    %c0_62 = arith.constant 0 : index
    %c0_63 = arith.constant 0 : index
    %c0_64 = arith.constant 0 : index
    %208 = vector.load %arg11[%c0_62, %c0_63, %c0_64] : memref<1x8x32xf32, #tpu.memory_space<vmem>>, vector<1x8x32xf32>
    %209 = vector.shape_cast %208 : vector<1x8x32xf32> to vector<8x32xf32>
    %210 = vector.shape_cast %207 : vector<8x32xf32> to vector<1x8x32xf32>
    tpu.vector_store %arg11[%c0_62, %c0_63, %c0_64], %210 {strides = array<i32>} : memref<1x8x32xf32, #tpu.memory_space<vmem>>, vector<1x8x32xf32>,
    return
  }
  func.func @transform_0(%arg0: i32) -> (i32, i32, i32) {
    %c0_i32 = arith.constant 0 : i32
    %c0_i32_0 = arith.constant 0 : i32
    %c0_i32_1 = arith.constant 0 : i32
    return %arg0, %c0_i32, %c0_i32_0 : i32, i32, i32
  }
  func.func @transform_1(%arg0: i32) -> (i32, i32) {
    %c0_i32 = arith.constant 0 : i32
    %c0_i32_0 = arith.constant 0 : i32
    %c0_i32_1 = arith.constant 0 : i32
    return %c0_i32, %c0_i32_0 : i32, i32
  }
  func.func @transform_2(%arg0: i32) -> (i32, i32) {
    %c0_i32 = arith.constant 0 : i32
    %c0_i32_0 = arith.constant 0 : i32
    %c0_i32_1 = arith.constant 0 : i32
    return %c0_i32, %c0_i32_0 : i32, i32
  }
  func.func @transform_3(%arg0: i32) -> (i32, i32) {
    %c0_i32 = arith.constant 0 : i32
    %c0_i32_0 = arith.constant 0 : i32
    %c0_i32_1 = arith.constant 0 : i32
    return %c0_i32, %c0_i32_0 : i32, i32
  }
  func.func @transform_4(%arg0: i32) -> (i32, i32) {
    %c0_i32 = arith.constant 0 : i32
    %c0_i32_0 = arith.constant 0 : i32
    %c0_i32_1 = arith.constant 0 : i32
    return %c0_i32, %c0_i32_0 : i32, i32
  }
  func.func @transform_5(%arg0: i32) -> (i32, i32) {
    %c0_i32 = arith.constant 0 : i32
    %c0_i32_0 = arith.constant 0 : i32
    %c0_i32_1 = arith.constant 0 : i32
    return %c0_i32, %c0_i32_0 : i32, i32
  }
  func.func @transform_6(%arg0: i32) -> (i32, i32) {
    %c0_i32 = arith.constant 0 : i32
    %c0_i32_0 = arith.constant 0 : i32
    %c0_i32_1 = arith.constant 0 : i32
    return %c0_i32, %c0_i32_0 : i32, i32
  }
  func.func @transform_7(%arg0: i32) -> (i32, i32) {
    %c0_i32 = arith.constant 0 : i32
    %c0_i32_0 = arith.constant 0 : i32
    %c0_i32_1 = arith.constant 0 : i32
    return %c0_i32, %c0_i32_0 : i32, i32
  }
  func.func @transform_8(%arg0: i32) -> (i32, i32) {
    %c0_i32 = arith.constant 0 : i32
    %c0_i32_0 = arith.constant 0 : i32
    %c0_i32_1 = arith.constant 0 : i32
    return %c0_i32, %c0_i32_0 : i32, i32
  }
  func.func @transform_9(%arg0: i32) -> (i32, i32) {
    %c0_i32 = arith.constant 0 : i32
    %c0_i32_0 = arith.constant 0 : i32
    %c0_i32_1 = arith.constant 0 : i32
    return %c0_i32, %c0_i32_0 : i32, i32
  }
  func.func @transform_10(%arg0: i32) -> (i32, i32, i32) {
    %c0_i32 = arith.constant 0 : i32
    %c0_i32_0 = arith.constant 0 : i32
    %c0_i32_1 = arith.constant 0 : i32
    return %arg0, %c0_i32, %c0_i32_0 : i32, i32, i32
  }
}

</mosaic_0001>

<bundles_post_ra>
// kernel: tpu_custom_call.1
= control target key start
LH: loop header
LB: loop body
LE: loop exit
PB: predicated region body
PF: predicated region fallthrough
CT: control target
= control target key end

     0   :  { %15 = vsyncpa [#allocation4], 0  ;;  %s2180_s0 = inlined_call_operand.vmem [shape: f32[2,8,32], index: 0, kind: input, shape index: {}]   ;;  %s2181_s1 = inlined_call_operand.vmem [shape: f32[8,8], index: 1, kind: input, shape index: {}]   ;;  %s2182_s2 = inlined_call_operand.vmem [shape: f32[1,32], index: 2, kind: input, shape index: {}]   ;;  %s2183_s3 = inlined_call_operand.vmem [shape: bf16[32,32], index: 3, kind: input, shape index: {}]   ;;  %s2184_s4 = inlined_call_operand.vmem [shape: bf16[32,16], index: 4, kind: input, shape index: {}]   ;;  %s2185_s5 = inlined_call_operand.vmem [shape: bf16[32,16], index: 5, kind: input, shape index: {}]   ;;  %s2186_s6 = inlined_call_operand.vmem [shape: bf16[32,32], index: 6, kind: input, shape index: {}]   ;;  %s2187_s7 = inlined_call_operand.vmem [shape: f32[1,32], index: 7, kind: input, shape index: {}]   ;;  %s2188_s8 = inlined_call_operand.vmem [shape: bf16[32,128], index: 8, kind: input, shape index: {}]   ;;  %s2189_s9 = inlined_call_operand.vmem [shape: bf16[64,32], index: 9, kind: input, shape index: {}]   ;;  %s2190_s10 = inlined_call_operand.hbm [shape: f32[2,8,32], index: 10, kind: output, shape index: {}]  }
   0x1   :  { %17 = vsyncpa [#allocation4 + $0x1], 0  ;;  %s1877_s13 = smov 0   ;;  %s1879_s14 = smov 0  }
   0x2   :  { %s1881_s15 = smov 0   ;;  %s1883_s16 = smov 0  }
   0x3 LB: > { %s1898_s17 = sadd.s32 4294967295, %s1804_s16   ;;  %s1447_s18 = sadd.s32 4294967294, %s1804_s16   ;;  %s1804_s16 = sphi %s1883_s16, %s2196_s16   ;;  %s1800_s15 = sphi %s1881_s15, %s2195_s15   ;;  %s1796_s14 = sphi %s1879_s14, %s2194_s14   ;;  %s1792_s13 = sphi %s1877_s13, %s2193_s13  }
   0x4   : > { %s1902_s19 = sadd.s32 1, %s1804_s16   ;;  %s245_s20 = sadd.s32 1, %s1800_s15 }
   0x5   : > { %s242_s21 = ssub.s32 %s1804_s16, %s1902_s19  ;;  %p255_p0 = scmp.ne.s32.totalorder %s1800_s15, %s1796_s14 }
   0x6   : > { %p243_p1 = scmp.eq.s32.totalorder %s242_s21, 0  ;;  %p256_p2 = scmp.eq.s32.totalorder %s1898_s17, 1 }
   0x7   : > { %p261_p3 = scmp.ne.s32.totalorder %s1796_s14, %s1792_s13  ;;  %p262_p4 = scmp.eq.s32.totalorder %s1447_s18, 1 }
   0x8   : > { %s1913_s22 = scalar_select %p243_p1, %s1800_s15, %s245_s20  }
   0x9   : > { %p1915_p5 = por %p256_p2, %p255_p0  ;;  %p1919_p6 = por %p262_p4, %p261_p3 }
   0xa   : > { %p1450_p7 = scmp.ge.s32.totalorder %s1804_s16, 1  ;;  %p314_p8 = scmp.lt.s32.totalorder %s1804_s16, 3 }
   0xc   : > { %p315_p9 = pnand %p1450_p7, %p314_p8 }
   0xd   : > { %p351_p10 = scmp.lt.s32.totalorder (!%p315_p9), %s1898_s17, 1  ;;  %vm358_vm0 = vcmask (!%p315_p9), 261120   ;;  %v1704_v3 = vld [vmem:[%s2183_s3] sm:$0xff] (!%p315_p9)   ;;  %v1806_v5 = vmov (!%p315_p9), 0.0   ;;  %v1706_v6 = vld [vmem:[%s2183_s3 + $0x8] sm:$0xff] (!%p315_p9)   ;;  %vm1807_vm1 = vmmov (!%p315_p9), 0  }
   0xe   : > { %318 = sbr.rel (%p315_p9) target bundleno = 2473 (0x9a9), region = 60  ;;  %v1705_v4 = vld [vmem:[%s2184_s4] sm:$0xff] (!%p315_p9)   ;;  %1530 = vmatprep.subr.bf16.mxu0 (!%p315_p9), %v1806_v5  ;;  %1538 = vmatprep.subr.bf16.mxu1 (!%p315_p9), %v1806_v5  ;;  %v1707_v7 = vld [vmem:[%s2184_s4 + $0x8] sm:$0xff] (!%p315_p9)   ;;  %s1809_s30 = smov (!%p315_p9), 4   ;;  %vm657_vm2 = vcmask (!%p315_p9), 1043456   ;;  %vm575_vm3 = vcmask (!%p315_p9), 31744  }
   0xf   : > { %1531 = vmatpush3.bf16.msra.mxu0 (!%p315_p9), %v1704_v3  ;;  %1539 = vmatpush3.bf16.msra.mxu1 (!%p315_p9), %v1705_v4  ;;  %v1960_v8 = vld [vmem:[%s2181_s1] sm:$0xff] (!%p315_p9)  ;;  %s1810_s11 = smov (!%p315_p9), 12   ;;  %s1811_s12 = smov (!%p315_p9), 16   ;;  %v1709_v18 = vld [vmem:[%s2185_s5 + $0x8] sm:$0xff] (!%p315_p9)   ;;  %vm593_vm4 = vcmask (!%p315_p9), 64512   ;;  %vm702_vm6 = vcmask (!%p315_p9), 60416  }
  0x10   : > { %1532 = vmatprep.subr.bf16.mxu0 (!%p315_p9), %v1806_v5  ;;  %1540 = vmatprep.subr.bf16.mxu1 (!%p315_p9), %v1806_v5  ;;  %s1812_s18 = smov (!%p315_p9), 20   ;;  %s1813_s20 = smov (!%p315_p9), 24   ;;  %v1453_v13 = vld [vmem:[%s2182_s2] ss:$0 sm:$0xff] (!%p315_p9)  ;;  %vm839_vm7 = vcmask (!%p315_p9), 126016   ;;  %vm1007_vm8 = vcmask (!%p315_p9), 191616  }
  0x11   : > { %1534 = vmatprep.mubr.msk.bf16.mxu0 (!%p315_p9), %vm1807_vm1, %v1806_v5  ;;  %1542 = vmatprep.mubr.msk.bf16.mxu1 (!%p315_p9), %vm1807_vm1, %v1806_v5  ;;  %s1814_s21 = smov (!%p315_p9), 124   ;;  %v1708_v16 = vld [vmem:[%s2185_s5] sm:$0xff] (!%p315_p9)   ;;  %vm1144_vm9 = vcmask (!%p315_p9), 257216   ;;  %vm1328_vm10 = vcmask (!%p315_p9), 523264  }
  0x13   : > { %1533 = vmatpush3.bf16.msra.mxu0 (!%p315_p9), %v1706_v6  ;;  %1541 = vmatpush3.bf16.msra.mxu1 (!%p315_p9), %v1707_v7 }
  0x14   : > { %1546 = vmatprep.subr.bf16.mxu0 (!%p315_p9), %v1806_v5  ;;  %1554 = vmatprep.subr.bf16.mxu1 (!%p315_p9), %v1806_v5 }
  0x15   : > { %s352_s25 = scalar_select %p351_p10, %s1898_s17, 1 }
  0x17   : > { %s1452_s26 = sshll.u32 %s352_s25, 3  ;;  %s1815_s25 = smov 28  }
  0x18   : > { %s354_s29 = scalar_lea.vmem %s2180_s0, %s1452_s26  ;;  %s1816_s26 = smov 120  }
  0x19   : > { %v1930_v0 = vld [vmem:[%s354_s29] sm:$0xff]  ;;  %s1808_s29 = smov 8  }
  0x1a   : > { %v357_v1 = vmul.f32 %v1930_v0, %v1930_v0  ;;  %704 = vrot.lane.b32.xlu1 %v1960_v8, %s1808_s29 }
  0x1c   : > { %v359_v2 = vsel %vm358_vm0, %v357_v1, 0.0 }
  0x1d   : > { %360 = vadd.xlane.f32.xlu0 %v359_v2 }
  0x1e   : > { %713 = vrot.lane.b32.xlu1 %v1960_v8, %s1810_s11 }
  0x22   : > { %863 = vrot.lane.b32.xlu1 %v1960_v8, %s1811_s12 }
  0x26   : > { %872 = vrot.lane.b32.xlu1 %v1960_v8, %s1812_s18 }
  0x2a   : > { %1009 = vrot.lane.b32.xlu1 %v1960_v8, %s1813_s20 }
  0x2e   : > { %566 = vrot.lane.b32.xlu1 %v1960_v8, %s1814_s21 }
  0x33   : > { %562 = vrot.lane.b32.xlu0 %v1960_v8, %s1809_s30 }
  0x8c   : > { %v705_v19 = vpop.permute.xlu1 %704 }
  0x90   : > { %v714_v20 = vpop.permute.xlu1 %713 }
  0x94   : > { %v864_v22 = vpop.permute.xlu1 %863 }
  0x98   : > { %v873_v35 = vpop.permute.xlu1 %872 }
  0x9c   : > { %v1010_v44 = vpop.permute.xlu1 %1009 }
  0xa0   : > { %v567_v48 = vpop.permute.xlu1 %566 }
  0xaa   : > { %v361_v9 = vpop.xlane.xlu0 %360 }
  0xab   : > { %v363_v10 = vmul.f32 0.03125, %v361_v9 }
  0xad   : > { %v364_v11 = vadd.f32 1e-06, %v363_v10 }
  0xae   : > { %v563_v21 = vpop.permute.xlu0 %562 }
  0xaf   : > { %1718 = vrsqrt.f32 %v364_v11 }
  0xb9   : > { %v1719_v12 = vpop.eup %1718 }
  0xba   : > { %v366_v14 = vmul.f32 %v1719_v12, %v1930_v0 }
  0xbc   : > { %v374_v15 = vmul.f32 %v1453_v13, %v366_v14 }
  0xbe   : > { %v375_v17 = vpack.c.bf16 %v374_v15, %v374_v15 }
  0xc0   : > { %1535 = vmatmul.mubr.msk.bf16.vlgmr.msra.gmra.mrb[0].mxu0 %vm358_vm0, %v375_v17  ;;  %1543 = vmatmul.mubr.msk.bf16.vlgmr.msra.gmra.mrb[0].mxu1 %vm358_vm0, %v375_v17 }
  0xc1   : > { %1547 = vmatpush3.bf16.msra.mxu0 %v1708_v16  ;;  %1550 = vmatprep.mubr.msk.bf16.mxu0 %vm1807_vm1, %v1806_v5 }
  0xc2   : > { %1548 = vmatprep.subr.bf16.mxu0 %v1806_v5  ;;  %1556 = vmatprep.mubr.msk.bf16.mxu1 %vm1807_vm1, %v1806_v5 }
  0xc5   : > { %1549 = vmatpush3.bf16.msra.mxu0 %v1709_v18 }
  0xc6   : > { %1560 = vmatprep.subr.bf16.mxu0 %v1806_v5 }
  0xc8   : > { %1551 = vmatmul.mubr.msk.bf16.vlgmr.msra.gmra.mrb[4].mxu0 %vm358_vm0, %v375_v17 }
  0xc9   : > { %1562 = vmatprep.mubr.msk.bf16.mxu0 %vm1807_vm1, %v1806_v5 }
 0x193   : > { %v1995_v23 = vpop.f32.mrb[0].mxu0  ;;  %v485_v24 = vpop.f32.mrb[0].mxu1 }
 0x194   : > { %v1998_v25 = vmul.f32 %v563_v21, %v1995_v23  ;;  %v1536_v26 = vpop.f32.mrb[1].mxu0  ;;  %v1544_v27 = vpop.f32.mrb[1].mxu1  ;;  %v707_v28 = vmul.f32 %v705_v19, %v1995_v23  ;;  %v2004_v33 = vmul.f32 %v563_v21, %v485_v24  ;;  %v841_v34 = vmul.f32 %v705_v19, %v485_v24 }
 0x195   : > { %v432_v29 = vpop.f32.mrb[2].mxu0  ;;  %v488_v30 = vpop.f32.mrb[2].mxu1  ;;  %v866_v39 = vmul.f32 %v864_v22, %v1995_v23  ;;  %v716_v40 = vmul.f32 %v714_v20, %v1995_v23  ;;  %v1012_v45 = vmul.f32 %v1010_v44, %v1995_v23  ;;  %v875_v46 = vmul.f32 %v873_v35, %v1995_v23 }
 0x196   : > { %v1545_v31 = vpop.f32.mrb[3].mxu1  ;;  %709 = vrot.lane.b32.xlu1 %v707_v28, %s1814_s21  ;;  %v1537_v32 = vpop.f32.mrb[3].mxu0  ;;  %718 = vrot.lane.b32.xlu0 %v1998_v25, %s1809_s30  ;;  %v555_v47 = vmul.f32 %v1960_v8, %v485_v24  ;;  %v569_v49 = vmul.f32 %v567_v48, %v485_v24  ;;  %v578_v50 = vmul.f32 %v1960_v8, %v1995_v23 }
 0x197   : > { %v585_v51 = vmul.f32 %v567_v48, %v1995_v23  ;;  %v847_v57 = vmul.f32 %v714_v20, %v485_v24 }
 0x19a   : > { %843 = vrot.lane.b32.xlu1 %v841_v34, %s1814_s21  ;;  %849 = vrot.lane.b32.xlu0 %v2004_v33, %s1809_s30 }
 0x19b   : > { %v541_v36 = vpop.f32.mrb[4].mxu0 }
 0x19c   : > { %v2009_v37 = vpack.c.bf16 %v541_v36, %v541_v36  ;;  %v1552_v38 = vpop.f32.mrb[5].mxu0 }
 0x19d   : > { %v544_v41 = vpop.f32.mrb[6].mxu0 }
 0x19e   : > { %v2015_v42 = vsel %vm657_vm2, %v2009_v37, 0  ;;  %868 = vrot.lane.b32.xlu1 %v866_v39, %s1814_s21  ;;  %v1553_v43 = vpop.f32.mrb[7].mxu0  ;;  %877 = vrot.lane.b32.xlu0 %v716_v40, %s1809_s30 }
 0x19f   : > { %1561 = vmatpush3.bf16.msra.mxu0 %v2015_v42 }
 0x1a0   : > { %1572 = vmatprep.subr.bf16.mxu0 %v1806_v5 }
 0x1a2   : > { %1018 = vrot.lane.b32.xlu1 %v1960_v8, %s1815_s25  ;;  %1014 = vrot.lane.b32.xlu0 %v1012_v45, %s1814_s21  ;;  %s1820_s25 = smov 64  }
 0x1a6   : > { %1023 = vrot.lane.b32.xlu1 %v875_v46, %s1809_s30  ;;  %557 = vrot.lane.b32.xlu0 %v555_v47, %s1814_s21 }
 0x1aa   : > { %571 = vrot.lane.b32.xlu1 %v569_v49, %s1809_s30  ;;  %580 = vrot.lane.b32.xlu0 %v578_v50, %s1814_s21  ;;  %s1818_s21 = smov 104   ;;  %v549_v49 = vlaneseq }
 0x1ae   : > { %587 = vrot.lane.b32.xlu1 %v585_v51, %s1809_s30  ;;  %s1817_s30 = smov 112   ;;  %v552_v51 = vand.u32 127, %v549_v49 }
 0x208   : > { %v710_v52 = vpop.permute.xlu1 %709  ;;  %v719_v53 = vpop.permute.xlu0 %718 }
 0x209   : > { %v712_v54 = vsub.f32 %v707_v28, %v710_v52  ;;  %v721_v55 = vadd.f32 %v719_v53, %v716_v40  ;;  %v1819_v53 = vmov -1e+30  }
 0x20b   : > { %v1684_v56 = vpack.i.bf16 %v721_v55, %v712_v54 }
 0x20c   : > { %v844_v58 = vpop.permute.xlu1 %843  ;;  %v850_v59 = vpop.permute.xlu0 %849 }
 0x20d   : > { %v846_v60 = vsub.f32 %v841_v34, %v844_v58  ;;  %v852_v61 = vadd.f32 %v850_v59, %v847_v57  ;;  %1685 = vrot.lane.b32.xlu0 %v1684_v56, %s1816_s26 }
 0x20f   : > { %v1689_v62 = vpack.i.bf16 %v852_v61, %v846_v60 }
 0x210   : > { %v869_v63 = vpop.permute.xlu1 %868  ;;  %v878_v1 = vpop.permute.xlu0 %877 }
 0x211   : > { %v871_v2 = vsub.f32 %v866_v39, %v869_v63  ;;  %v880_v3 = vadd.f32 %v878_v1, %v875_v46  ;;  %1690 = vrot.lane.b32.xlu1 %v1689_v62, %s1816_s26 }
 0x213   : > { %v1694_v4 = vpack.i.bf16 %v880_v3, %v871_v2 }
 0x214   : > { %v1019_v6 = vpop.permute.xlu1 %1018  ;;  %v1015_v7 = vpop.permute.xlu0 %1014 }
 0x215   : > { %1695 = vrot.lane.b32.xlu0 %v1694_v4, %s1817_s30  ;;  %v1021_v8 = vmul.f32 %v1019_v6, %v1995_v23  ;;  %v1017_v10 = vsub.f32 %v1012_v45, %v1015_v7 }
 0x218   : > { %v1024_v9 = vpop.permute.xlu1 %1023  ;;  %v558_v12 = vpop.permute.xlu0 %557 }
 0x219   : > { %v1026_v11 = vadd.f32 %v1024_v9, %v1021_v8  ;;  %v560_v15 = vsub.f32 %v555_v47, %v558_v12 }
 0x21b   : > { %v1699_v13 = vpack.i.bf16 %v1026_v11, %v1017_v10 }
 0x21c   : > { %v572_v14 = vpop.permute.xlu1 %571  ;;  %v581_v19 = vpop.permute.xlu0 %580 }
 0x21d   : > { %v574_v16 = vadd.f32 %v572_v14, %v2004_v33  ;;  %1700 = vrot.lane.b32.xlu1 %v1699_v13, %s1818_s21  ;;  %v583_v23 = vsub.f32 %v578_v50, %v581_v19  ;;  %v550_v50 = vshrl.u32 %v549_v49, 7  ;;  %s1488_s21 = sshll.u32 %s1898_s17, 7 }
 0x21f   : > { %v576_v17 = vsel %vm575_vm3, %v560_v15, %v574_v16  ;;  %vm553_vm5 = vcmp.ge.s32.totalorder %v550_v50, %v552_v51 }
 0x220   : > { %v577_v18 = vpack.c.bf16 %v576_v17, %v576_v17  ;;  %v588_v20 = vpop.permute.xlu1 %587  ;;  %v554_v54 = vsel %vm553_vm5, 0.0, %v1819_v53 }
 0x221   : > { %v590_v21 = vadd.f32 %v588_v20, %v1998_v25 }
 0x222   : > { %v598_v22 = vsel %vm593_vm4, %v577_v18, 0 }
 0x223   : > { %1555 = vmatpush3.bf16.xpose.msra.mxu1 %v598_v22  ;;  %v591_v24 = vsel %vm575_vm3, %v583_v23, %v590_v21 }
 0x224   : > { %1566 = vmatprep.subr.bf16.mxu1 %v1806_v5  ;;  %v592_v26 = vpack.c.bf16 %v591_v24, %v591_v24 }
 0x22a   : > { %1557 = vmatmul.mubr.msk.bf16.vlgmr.msra.gmra.mrb[4].mxu1 %vm593_vm4, %v592_v26 }
 0x22b   : > { %1567 = vmatpush3.bf16.xpose.msra.mxu1 %v598_v22  ;;  %1568 = vmatprep.mubr.msk.bf16.mxu1 %vm1807_vm1, %v1806_v5 }
 0x22c   : > { %1578 = vmatprep.subr.bf16.mxu1 %v1806_v5 }
 0x27f   : > { %v1686_v27 = vpop.permute.xlu0 %1685 }
 0x280   : > { %v1688_v28 = vunpack.i.h.bf16 %v1686_v27  ;;  %v1687_v25 = vunpack.i.l.bf16 %v1686_v27 }
 0x282   : > { %v730_v29 = vsel %vm575_vm3, %v1687_v25, %v1688_v28 }
 0x283   : > { %v731_v30 = vpack.c.bf16 %v730_v29, %v730_v29  ;;  %v1691_v31 = vpop.permute.xlu1 %1690 }
 0x284   : > { %v1693_v32 = vunpack.i.h.bf16 %v1691_v31  ;;  %v1692_v33 = vunpack.i.l.bf16 %v1691_v31 }
 0x285   : > { %1569 = vmatmul.mubr.msk.bf16.vlgmr.msra.gmra.mrb[8].mxu1 %vm593_vm4, %v731_v30 }
 0x286   : > { %v861_v34 = vsel %vm575_vm3, %v1692_v33, %v1693_v32  ;;  %1580 = vmatprep.mubr.msk.bf16.mxu1 %vm1807_vm1, %v1806_v5 }
 0x287   : > { %v1696_v35 = vpop.permute.xlu0 %1695  ;;  %v862_v36 = vpack.c.bf16 %v861_v34, %v861_v34 }
 0x288   : > { %v1698_v38 = vunpack.i.h.bf16 %v1696_v35  ;;  %v1697_v39 = vunpack.i.l.bf16 %v1696_v35 }
 0x289   : > { %v895_v40 = vsel %vm593_vm4, %v862_v36, 0 }
 0x28a   : > { %1579 = vmatpush3.bf16.xpose.msra.mxu1 %v895_v40  ;;  %v889_v41 = vsel %vm575_vm3, %v1697_v39, %v1698_v38 }
 0x28b   : > { %1590 = vmatprep.subr.bf16.mxu1 %v1806_v5  ;;  %v890_v43 = vpack.c.bf16 %v889_v41, %v889_v41 }
 0x28f   : > { %v1701_v44 = vpop.permute.xlu1 %1700 }
 0x290   : > { %v1703_v45 = vunpack.i.h.bf16 %v1701_v44  ;;  %v1702_v46 = vunpack.i.l.bf16 %v1701_v44 }
 0x291   : > { %1581 = vmatmul.mubr.msk.bf16.vlgmr.msra.gmra.mrb[12].mxu1 %vm593_vm4, %v890_v43 }
 0x292   : > { %1591 = vmatpush3.bf16.xpose.msra.mxu1 %v895_v40  ;;  %1592 = vmatprep.mubr.msk.bf16.mxu1 %vm1807_vm1, %v1806_v5  ;;  %v1035_v47 = vsel %vm575_vm3, %v1702_v46, %v1703_v45 }
 0x293   : > { %1602 = vmatprep.subr.bf16.mxu1 %v1806_v5  ;;  %v1036_v48 = vpack.c.bf16 %v1035_v47, %v1035_v47 }
 0x299   : > { %1593 = vmatmul.mubr.msk.bf16.vlgmr.msra.gmra.mrb[16].mxu1 %vm593_vm4, %v1036_v48 }
 0x29a   : > { %1606 = vmatprep.mubr.msk.bf16.mxu1 %vm1807_vm1, %v1806_v5 }
 0x2fd   : > { %v634_v52 = vpop.f32.mrb[4].mxu1 }
 0x2fe   : > { %v640_v55 = vmul.f32 0.35355338, %v634_v52  ;;  %v1558_v56 = vpop.f32.mrb[5].mxu1 }
 0x2ff   : > { %v637_v57 = vpop.f32.mrb[6].mxu1 }
 0x300   : > { %v1559_v58 = vpop.f32.mrb[7].mxu1  ;;  %v641_v59 = vadd.f32 %v640_v55, %v554_v54 }
 0x302   : > { %v642_v60 = vsel %vm593_vm4, %v641_v59, -inf }
 0x303   : > { %643 = vmax.xlane.f32.xlu0 %v642_v60 }
 0x358   : > { %v769_v61 = vpop.f32.mrb[8].mxu1 }
 0x359   : > { %v775_v62 = vmul.f32 0.35355338, %v769_v61  ;;  %v1570_v63 = vpop.f32.mrb[9].mxu1 }
 0x35a   : > { %v772_v1 = vpop.f32.mrb[10].mxu1 }
 0x35b   : > { %v1571_v2 = vpop.f32.mrb[11].mxu1  ;;  %v776_v3 = vadd.f32 %v775_v62, %v554_v54 }
 0x35d   : > { %v777_v4 = vsel %vm593_vm4, %v776_v3, -inf }
 0x35e   : > { %778 = vmax.xlane.f32.xlu1 %v777_v4 }
 0x364   : > { %v931_v6 = vpop.f32.mrb[12].mxu1 }
 0x365   : > { %v937_v7 = vmul.f32 0.35355338, %v931_v6  ;;  %v1582_v8 = vpop.f32.mrb[13].mxu1  ;;  %v1710_v6 = vld [vmem:[%s2186_s6] sm:$0xff]  }
 0x366   : > { %v934_v9 = vpop.f32.mrb[14].mxu1  ;;  %1603 = vmatpush3.bf16.msra.mxu1 %v1710_v6  ;;  %v1711_v8 = vld [vmem:[%s2186_s6 + $0x8] sm:$0xff]  }
 0x367   : > { %v1583_v10 = vpop.f32.mrb[15].mxu1  ;;  %v938_v11 = vadd.f32 %v937_v7, %v554_v54  ;;  %1604 = vmatprep.subr.bf16.mxu1 %v1806_v5 }
 0x369   : > { %v939_v12 = vsel %vm593_vm4, %v938_v11, -inf }
 0x36a   : > { %940 = vmax.xlane.f32.xlu0 %v939_v12  ;;  %1605 = vmatpush3.bf16.msra.mxu1 %v1711_v8 }
 0x36b   : > { %1618 = vmatprep.subr.bf16.mxu1 %v1806_v5 }
 0x36c   : > { %v1074_v13 = vpop.f32.mrb[16].mxu1 }
 0x36d   : > { %v1080_v14 = vmul.f32 0.35355338, %v1074_v13  ;;  %v1594_v15 = vpop.f32.mrb[17].mxu1 }
 0x36e   : > { %v1077_v16 = vpop.f32.mrb[18].mxu1 }
 0x36f   : > { %v1595_v17 = vpop.f32.mrb[19].mxu1  ;;  %v1081_v18 = vadd.f32 %v1080_v14, %v554_v54 }
 0x371   : > { %v1082_v19 = vsel %vm593_vm4, %v1081_v18, -inf }
 0x372   : > { %1083 = vmax.xlane.f32.xlu0 %v1082_v19 }
 0x390   : > { %v644_v20 = vpop.xlane.xlu0 %643 }
 0x391   : > { %v645_v21 = vsub.f32 %v641_v59, %v644_v20 }
 0x393   : > { %v646_v22 = vmul.f32 1.442695, %v645_v21 }
 0x395   : > { %1720 = vpow2.f32 %v646_v22 }
 0x39f   : > { %v1721_v23 = vpop.eup %1720 }
 0x3a0   : > { %v648_v24 = vsel %vm593_vm4, %v1721_v23, 0.0 }
 0x3a1   : > { %649 = vadd.xlane.f32.xlu1 %v648_v24 }
 0x3eb   : > { %v779_v26 = vpop.xlane.xlu1 %778 }
 0x3ec   : > { %v780_v27 = vsub.f32 %v776_v3, %v779_v26 }
 0x3ee   : > { %v781_v28 = vmul.f32 1.442695, %v780_v27 }
 0x3f0   : > { %1722 = vpow2.f32 %v781_v28 }
 0x3f7   : > { %v941_v25 = vpop.xlane.xlu0 %940 }
 0x3f8   : > { %v942_v29 = vsub.f32 %v938_v11, %v941_v25 }
 0x3fa   : > { %v1723_v30 = vpop.eup %1722  ;;  %v943_v31 = vmul.f32 1.442695, %v942_v29  ;;  %v1712_v29 = vld [vmem:[%s2188_s8] sm:$0xff]  }
 0x3fb   : > { %v783_v32 = vsel %vm593_vm4, %v1723_v30, 0.0 }
 0x3fc   : > { %1724 = vpow2.f32 %v943_v31  ;;  %784 = vadd.xlane.f32.xlu0 %v783_v32 }
 0x3ff   : > { %v1084_v33 = vpop.xlane.xlu0 %1083 }
 0x400   : > { %v1085_v34 = vsub.f32 %v1081_v18, %v1084_v33 }
 0x402   : > { %v1086_v35 = vmul.f32 1.442695, %v1085_v34  ;;  %v1477_v34 = vld [vmem:[%s2187_s7] ss:$0 sm:$0xff] }
 0x404   : > { %1726 = vpow2.f32 %v1086_v35 }
 0x406   : > { %v1725_v36 = vpop.eup %1724 }
 0x407   : > { %v945_v38 = vsel %vm593_vm4, %v1725_v36, 0.0 }
 0x408   : > { %946 = vadd.xlane.f32.xlu1 %v945_v38 }
 0x40e   : > { %v1727_v39 = vpop.eup %1726 }
 0x40f   : > { %v1088_v40 = vsel %vm593_vm4, %v1727_v39, 0.0 }
 0x410   : > { %1089 = vadd.xlane.f32.xlu0 %v1088_v40  ;;  %v1715_v40 = vld [vmem:[%s2189_s9 + $0x8] sm:$0xff]  }
 0x419   : > { %952 = vrot.lane.b32.xlu1 %v2009_v37, %s1816_s26  ;;  %s348_s26 = sand.u32 1, %s1796_s14  }
 0x41a   : > { %s1451_s30 = sshll.u32 %s348_s26, 3  ;;  %s1375_s17 = scalar_lea.sflag [#allocation4], %s348_s26 }
 0x41b   : > { %s350_s27 = scalar_lea.vmem [#allocation3], %s1451_s30 }
 0x41c   : > { %s1388_s28 = sshll.u32 %s350_s27, 4  ;;  %s2139_s28 = int_to_ptr.vmem [resolvable:$true] %s1388_s28 }
 0x42e   : > { %v650_v41 = vpop.xlane.xlu1 %649 }
 0x42f   : > { %1728 = vrcp.f32 %v650_v41  ;;  %v1716_v41 = vld [vmem:[%s2189_s9 + $0x10] sm:$0xff]  }
 0x439   : > { %v1729_v43 = vpop.eup %1728 }
 0x43a   : > { %v652_v44 = vmul.f32 %v1729_v43, %v1721_v23  ;;  %v1717_v43 = vld [vmem:[%s2189_s9 + $0x18] sm:$0xff]  }
 0x43c   : > { %v653_v45 = vpack.c.bf16 %v652_v44, %v652_v44 }
 0x43e   : > { %1563 = vmatmul.mubr.msk.bf16.vlgmr.msra.gmra.mrb[8].mxu0 %vm593_vm4, %v653_v45 }
 0x43f   : > { %1573 = vmatpush3.bf16.msra.mxu0 %v2015_v42  ;;  %1574 = vmatprep.mubr.msk.bf16.mxu0 %vm1807_vm1, %v1806_v5 }
 0x440   : > { %1584 = vmatprep.subr.bf16.mxu0 %v1806_v5 }
 0x489   : > { %v785_v46 = vpop.xlane.xlu0 %784 }
 0x48a   : > { %1730 = vrcp.f32 %v785_v46 }
 0x494   : > { %v1731_v47 = vpop.eup %1730 }
 0x495   : > { %v787_v48 = vmul.f32 %v1731_v47, %v1723_v30  ;;  %v947_v49 = vpop.xlane.xlu1 %946  ;;  %v1713_v30 = vld [vmem:[%s2188_s8 + $0x8] sm:$0xff]  }
 0x496   : > { %1732 = vrcp.f32 %v947_v49 }
 0x497   : > { %v788_v37 = vpack.c.bf16 %v787_v48, %v787_v48 }
 0x499   : > { %v953_v50 = vpop.permute.xlu1 %952  ;;  %1575 = vmatmul.mubr.msk.bf16.vlgmr.msra.gmra.mrb[12].mxu0 %vm593_vm4, %v788_v37 }
 0x49a   : > { %v958_v51 = vsel %vm657_vm2, %v953_v50, 0  ;;  %1586 = vmatprep.mubr.msk.bf16.mxu0 %vm1807_vm1, %v1806_v5 }
 0x49b   : > { %1585 = vmatpush3.bf16.msra.mxu0 %v958_v51 }
 0x49c   : > { %1596 = vmatprep.subr.bf16.mxu0 %v1806_v5 }
 0x49d   : > { %v1090_v42 = vpop.xlane.xlu0 %1089 }
 0x49e   : > { %1734 = vrcp.f32 %v1090_v42 }
 0x4a0   : > { %v1733_v52 = vpop.eup %1732 }
 0x4a1   : > { %v949_v53 = vmul.f32 %v1733_v52, %v1725_v36 }
 0x4a3   : > { %v950_v54 = vpack.c.bf16 %v949_v53, %v949_v53 }
 0x4a5   : > { %1587 = vmatmul.mubr.msk.bf16.vlgmr.msra.gmra.mrb[16].mxu0 %vm593_vm4, %v950_v54 }
 0x4a6   : > { %1597 = vmatpush3.bf16.msra.mxu0 %v958_v51  ;;  %1598 = vmatprep.mubr.msk.bf16.mxu0 %vm1807_vm1, %v1806_v5 }
 0x4a7   : > { %1610 = vmatprep.subr.bf16.mxu0 %v1806_v5 }
 0x4a8   : > { %v1735_v55 = vpop.eup %1734 }
 0x4a9   : > { %v1092_v56 = vmul.f32 %v1735_v55, %v1727_v39  ;;  %v1714_v39 = vld [vmem:[%s2189_s9] sm:$0xff]  }
 0x4ab   : > { %v1093_v57 = vpack.c.bf16 %v1092_v56, %v1092_v56 }
 0x4ad   : > { %1599 = vmatmul.mubr.msk.bf16.vlgmr.msra.gmra.mrb[20].mxu0 %vm593_vm4, %v1093_v57 }
 0x4ae   : > { %1614 = vmatprep.mubr.msk.bf16.mxu0 %vm1807_vm1, %v1806_v5  ;;  %1611 = vmatpush3.bf16.msra.mxu0 %v1712_v29 }
 0x4af   : > { %1612 = vmatprep.subr.bf16.mxu0 %v1806_v5 }
 0x4b2   : > { %1613 = vmatpush3.bf16.msra.mxu0 %v1713_v30 }
 0x511   : > { %v695_v58 = vpop.f32.mrb[8].mxu0 }
 0x512   : > { %v701_v59 = vpack.c.bf16 %v695_v58, %v695_v58  ;;  %v1564_v60 = vpop.f32.mrb[9].mxu0 }
 0x513   : > { %v698_v61 = vpop.f32.mrb[10].mxu0 }
 0x514   : > { %703 = vst.msk [vmem:[#allocation2] sm:$0xf] %vm702_vm6, %v701_v59  ;;  %v1565_v62 = vpop.f32.mrb[11].mxu0 }
 0x56c   : > { %v826_v63 = vpop.f32.mrb[12].mxu0 }
 0x56d   : > { %v1491_v1 = vpack.c.bf16 %v826_v63, %v826_v63  ;;  %v1576_v2 = vpop.f32.mrb[13].mxu0 }
 0x56e   : > { %v829_v3 = vpop.f32.mrb[14].mxu0 }
 0x56f   : > { %836 = vrot.lane.b32.xlu0 %v1491_v1, %s1808_s29  ;;  %v1577_v4 = vpop.f32.mrb[15].mxu0  ;;  %s2137_s29 = scalar_lea.hbm %s2190_s10, %s1488_s21 }
 0x578   : > { %v994_v7 = vpop.f32.mrb[16].mxu0 }
 0x579   : > { %v1492_v9 = vpack.c.bf16 %v994_v7, %v994_v7  ;;  %v1588_v10 = vpop.f32.mrb[17].mxu0 }
 0x57a   : > { %v997_v11 = vpop.f32.mrb[18].mxu0 }
 0x57b   : > { %1004 = vrot.lane.b32.xlu1 %v1492_v9, %s1811_s12  ;;  %v1589_v12 = vpop.f32.mrb[19].mxu0  ;;  %s1742_s12 = scalar_lea.vmem %s2139_s28, 128 }
 0x57c   : > { %p1743_p11 = scmp.ne.s32.totalorder %s2139_s28, %s1742_s12 }
 0x57e   : > { %p1744_p12 = pnand %p1743_p11, %p1915_p5 }
 0x580   : > { %v1131_v13 = vpop.f32.mrb[20].mxu0  ;;  %p1745_p13 = pneg %p1744_p12 }
 0x581   : > { %v1493_v14 = vpack.c.bf16 %v1131_v13, %v1131_v13  ;;  %v1600_v15 = vpop.f32.mrb[21].mxu0 }
 0x582   : > { %v1134_v16 = vpop.f32.mrb[22].mxu0 }
 0x583   : > { %1141 = vrot.lane.b32.xlu1 %v1493_v14, %s1813_s20  ;;  %v1601_v17 = vpop.f32.mrb[23].mxu0  ;;  %s1821_s20 = smov [#allocation3]  }
 0x5e1   : > { %v837_v18 = vpop.permute.xlu0 %836 }
 0x5e2   : > { %840 = vst.msk [vmem:[#allocation2] sm:$0xf] %vm839_vm7, %v837_v18 }
 0x5ed   : > { %v1005_v19 = vpop.permute.xlu1 %1004 }
 0x5ee   : > { %1008 = vst.msk [vmem:[#allocation2] sm:$0xf] %vm1007_vm8, %v1005_v19 }
 0x5f5   : > { %v1142_v20 = vpop.permute.xlu1 %1141 }
 0x5f6   : > { %1145 = vst.msk [vmem:[#allocation2] sm:$0xf] %vm1144_vm9, %v1142_v20 }
 0x5fd   : > { %v1146_v21 = vld [vmem:[#allocation2] sm:$0xf] }
 0x5fe   : > { %1607 = vmatmul.mubr.msk.bf16.vlgmr.msra.gmra.mrb[20].mxu1 %vm358_vm0, %v1146_v21 }
 0x5ff   : > { %1626 = vmatprep.mubr.msk.bf16.mxu1 %vm1807_vm1, %v1806_v5  ;;  %1619 = vmatpush3.bf16.msra.mxu1 %v1714_v39 }
 0x600   : > { %1620 = vmatprep.subr.bf16.mxu1 %v1806_v5 }
 0x603   : > { %1621 = vmatpush3.bf16.msra.mxu1 %v1715_v40 }
 0x604   : > { %1622 = vmatprep.subr.bf16.mxu1 %v1806_v5 }
 0x607   : > { %1623 = vmatpush3.bf16.msra.mxu1 %v1716_v41 }
 0x608   : > { %1624 = vmatprep.subr.bf16.mxu1 %v1806_v5 }
 0x60b   : > { %1625 = vmatpush3.bf16.msra.mxu1 %v1717_v43 }
 0x6d1   : > { %v1200_v22 = vpop.f32.mrb[20].mxu1 }
 0x6d2   : > { %v1206_v23 = vadd.f32 %v1200_v22, %v1930_v0  ;;  %v1608_v24 = vpop.f32.mrb[21].mxu1 }
 0x6d3   : > { %v1203_v26 = vpop.f32.mrb[22].mxu1 }
 0x6d4   : > { %v1609_v27 = vpop.f32.mrb[23].mxu1  ;;  %v1207_v28 = vmul.f32 %v1206_v23, %v1206_v23 }
 0x6d6   : > { %v1208_v25 = vsel %vm358_vm0, %v1207_v28, 0.0 }
 0x6d7   : > { %1209 = vadd.xlane.f32.xlu0 %v1208_v25 }
 0x764   : > { %v1210_v0 = vpop.xlane.xlu0 %1209 }
 0x765   : > { %v1211_v31 = vmul.f32 0.03125, %v1210_v0 }
 0x767   : > { %v1212_v32 = vadd.f32 1e-06, %v1211_v31 }
 0x769   : > { %1736 = vrsqrt.f32 %v1212_v32 }
 0x773   : > { %v1737_v33 = vpop.eup %1736 }
 0x774   : > { %v1214_v35 = vmul.f32 %v1737_v33, %v1206_v23 }
 0x776   : > { %v1222_v36 = vmul.f32 %v1477_v34, %v1214_v35 }
 0x778   : > { %v1223_v38 = vpack.c.bf16 %v1222_v36, %v1222_v36 }
 0x77a   : > { %1615 = vmatmul.mubr.msk.bf16.vlgmr.msra.gmra.mrb[24].mxu0 %vm358_vm0, %v1223_v38 }
 0x84d   : > { %v1277_v44 = vpop.f32.mrb[24].mxu0 }
 0x84e   : > { %1291 = vrot.lane.b32.xlu1 %v1277_v44, %s1820_s25  ;;  %v1616_v45 = vpop.f32.mrb[25].mxu0  ;;  %v1481_v48 = vmul.f32 -1.442695, %v1277_v44  ;;  %s1746_s25 = sshll.u32 %s1821_s20, 4  ;;  %s1747_s25 = int_to_ptr.vmem [resolvable:$false] %s1746_s25 }
 0x84f   : > { %v1280_v46 = vpop.f32.mrb[26].mxu0  ;;  %s1748_s30 = scalar_lea.vmem %s1747_s25, 256  ;;  %p1749_p0 = scmp.lt.s32.totalorder %s2139_s28, %s1747_s25 }
 0x850   : > { %v1617_v47 = vpop.f32.mrb[27].mxu0  ;;  %1738 = vpow2.f32 %v1481_v48  ;;  %p1750_p1 = scmp.lt.s32.totalorder %s1748_s30, %s1742_s12 }
 0x852   : > { %p1751_p2 = por %p1750_p1, %p1749_p0 }
 0x854   : > { %p1752_p3 = pnand %p1751_p2, %p1745_p13 }
 0x85a   : > { %v1739_v49 = vpop.eup %1738 }
 0x85b   : > { %v1286_v37 = vadd.f32 1.0, %v1739_v49 }
 0x85d   : > { %1740 = vrcp.f32 %v1286_v37 }
 0x867   : > { %v1741_v50 = vpop.eup %1740 }
 0x868   : > { %v1289_v5 = vmul.f32 %v1741_v50, %v1277_v44 }
 0x8c0   : > { %v1292_v51 = vpop.permute.xlu1 %1291 }
 0x8c1   : > { %v1294_v42 = vmul.f32 %v1292_v51, %v1289_v5 }
 0x8c3   : > { %v1295_v52 = vpack.c.bf16 %v1294_v42, %v1294_v42 }
 0x8c5   : > { %1627 = vmatmul.mubr.msk.bf16.vlgmr.msra.gmra.mrb[24].mxu1 %vm1328_vm10, %v1295_v52 }
 0x998   : > { %v1366_v53 = vpop.f32.mrb[24].mxu1 }
 0x999   : > { %v1372_v54 = vadd.f32 %v1366_v53, %v1206_v23  ;;  %v1628_v55 = vpop.f32.mrb[25].mxu1 }
 0x99a   : > { %v1369_v56 = vpop.f32.mrb[26].mxu1 }
 0x99b   : > { %v1629_v57 = vpop.f32.mrb[27].mxu1  ;;  %1373 = vst.msk [vmem:[%s350_s27] sm:$0xff] %vm358_vm0, %v1372_v54 }
 0x99c   : > { %1755 = shalt.err (!%p1752_p3)
}
 0x99d   : > { %s1756_s26 = scalar_lea.hbm %s2137_s29, 128  ;;  %s1760_s11 = scalar_lea.hbm %s2190_s10, 256 }
 0x99e   : > { %p1757_p4 = scmp.ne.s32.totalorder %s2137_s29, %s1756_s26  ;;  %p1761_p9 = scmp.lt.u32.totalorder %s2137_s29, %s2190_s10 }
 0x99f   : > { %p1762_p10 = scmp.lt.u32.totalorder %s1760_s11, %s1756_s26  ;;  %p1764_p12 = scmp.lt.u32.totalorder %s1756_s26, %s2137_s29 }
 0x9a0   : > { %p1758_p7 = pnand %p1757_p4, %p1915_p5 }
 0x9a1   : > { %p1763_p11 = por %p1762_p10, %p1761_p9 }
 0x9a2   : > { %p1759_p8 = pneg %p1758_p7 }
 0x9a3   : > { %p1765_p13 = por %p1764_p12, %p1763_p11 }
 0x9a5   : > { %p1766_p0 = pnand %p1765_p13, %p1759_p8 }
 0x9a7   : > { %1769 = shalt.err (!%p1766_p0)
}
 0x9a8   : > { %1630 = dma.vmem_to_hbm [thread:$0]  (%p1915_p5), %s2139_s28, 128, %s2137_s29, %s1375_s17  }
 0x9a9 PF: > { %p1636_p1 = scmp.ge.s32.totalorder %s1804_s16, 2  ;;  %s1400_s12 = sand.u32 1, %s1792_s13  }
 0x9aa   : > { %s1401_s25 = scalar_lea.sflag [#allocation4], %s1400_s12 }
 0x9ab   : > { %p1633_p2 = pnand %p1636_p1, %p1919_p6 }
 0x9ad   : > { %1787 = dma.done.wait (!%p1633_p2), %s1401_s25, 128  }
 0x9ae   : > { %1789 = vsyncadd (!%p1633_p2), %s1401_s25, 4294967168  ;;  %p20_p3 = scmp.ge.s32.totalorder %s1902_s19, 4   ;;  %s2193_s13 = smov %s1796_s14 }
 0x9af   : > { %s2194_s14 = smov %s1800_s15  ;;  %s2195_s15 = smov %s1913_s22 }
 0x9b0   : > { %s2196_s16 = smov %s1902_s19  ;;  %22 = sbr.rel (!%p20_p3) target bundleno = 3 (0x3), region = 95 }
 0x9b7   :  { %1406 = vsyncpa [#allocation4], 1 }
 0x9b8   :  { %1408 = vsyncpa [#allocation4 + $0x1], 1 }

// kernel: tpu_custom_call.1
= control target key start
LH: loop header
LB: loop body
LE: loop exit
PB: predicated region body
PF: predicated region fallthrough
CT: control target
= control target key end

     0   :  { %15 = vsyncpa [#allocation4], 0  ;;  %s2180_s0 = inlined_call_operand.vmem [shape: f32[2,8,32], index: 0, kind: input, shape index: {}]   ;;  %s2181_s1 = inlined_call_operand.vmem [shape: f32[8,8], index: 1, kind: input, shape index: {}]   ;;  %s2182_s2 = inlined_call_operand.vmem [shape: f32[1,32], index: 2, kind: input, shape index: {}]   ;;  %s2183_s3 = inlined_call_operand.vmem [shape: bf16[32,32], index: 3, kind: input, shape index: {}]   ;;  %s2184_s4 = inlined_call_operand.vmem [shape: bf16[32,16], index: 4, kind: input, shape index: {}]   ;;  %s2185_s5 = inlined_call_operand.vmem [shape: bf16[32,16], index: 5, kind: input, shape index: {}]   ;;  %s2186_s6 = inlined_call_operand.vmem [shape: bf16[32,32], index: 6, kind: input, shape index: {}]   ;;  %s2187_s7 = inlined_call_operand.vmem [shape: f32[1,32], index: 7, kind: input, shape index: {}]   ;;  %s2188_s8 = inlined_call_operand.vmem [shape: bf16[32,128], index: 8, kind: input, shape index: {}]   ;;  %s2189_s9 = inlined_call_operand.vmem [shape: bf16[64,32], index: 9, kind: input, shape index: {}]   ;;  %s2190_s10 = inlined_call_operand.hbm [shape: f32[2,8,32], index: 10, kind: output, shape index: {}]  }
   0x1   :  { %17 = vsyncpa [#allocation4 + $0x1], 0  ;;  %s1877_s13 = smov 0   ;;  %s1879_s14 = smov 0  }
   0x2   :  { %s1881_s15 = smov 0   ;;  %s1883_s16 = smov 0  }
   0x3 LB: > { %s1898_s17 = sadd.s32 4294967295, %s1804_s16   ;;  %s1447_s18 = sadd.s32 4294967294, %s1804_s16   ;;  %s1804_s16 = sphi %s1883_s16, %s2196_s16   ;;  %s1800_s15 = sphi %s1881_s15, %s2195_s15   ;;  %s1796_s14 = sphi %s1879_s14, %s2194_s14   ;;  %s1792_s13 = sphi %s1877_s13, %s2193_s13  }
   0x4   : > { %s1902_s19 = sadd.s32 1, %s1804_s16   ;;  %s245_s20 = sadd.s32 1, %s1800_s15 }
   0x5   : > { %s242_s21 = ssub.s32 %s1804_s16, %s1902_s19  ;;  %p255_p0 = scmp.ne.s32.totalorder %s1800_s15, %s1796_s14 }
   0x6   : > { %p243_p1 = scmp.eq.s32.totalorder %s242_s21, 0  ;;  %p256_p2 = scmp.eq.s32.totalorder %s1898_s17, 1 }
   0x7   : > { %p261_p3 = scmp.ne.s32.totalorder %s1796_s14, %s1792_s13  ;;  %p262_p4 = scmp.eq.s32.totalorder %s1447_s18, 1 }
   0x8   : > { %s1913_s22 = scalar_select %p243_p1, %s1800_s15, %s245_s20  }
   0x9   : > { %p1915_p5 = por %p256_p2, %p255_p0  ;;  %p1919_p6 = por %p262_p4, %p261_p3 }
   0xa   : > { %p1450_p7 = scmp.ge.s32.totalorder %s1804_s16, 1  ;;  %p314_p8 = scmp.lt.s32.totalorder %s1804_s16, 3 }
   0xc   : > { %p315_p9 = pnand %p1450_p7, %p314_p8 }
   0xd   : > { %p351_p10 = scmp.lt.s32.totalorder (!%p315_p9), %s1898_s17, 1  ;;  %vm358_vm0 = vcmask (!%p315_p9), 261120   ;;  %v1704_v3 = vld [vmem:[%s2183_s3] sm:$0xff] (!%p315_p9)   ;;  %v1806_v5 = vmov (!%p315_p9), 0.0   ;;  %v1706_v6 = vld [vmem:[%s2183_s3 + $0x8] sm:$0xff] (!%p315_p9)   ;;  %vm1807_vm1 = vmmov (!%p315_p9), 0  }
   0xe   : > { %318 = sbr.rel (%p315_p9) target bundleno = 2473 (0x9a9), region = 60  ;;  %v1705_v4 = vld [vmem:[%s2184_s4] sm:$0xff] (!%p315_p9)   ;;  %1530 = vmatprep.subr.bf16.mxu0 (!%p315_p9), %v1806_v5  ;;  %1538 = vmatprep.subr.bf16.mxu1 (!%p315_p9), %v1806_v5  ;;  %v1707_v7 = vld [vmem:[%s2184_s4 + $0x8] sm:$0xff] (!%p315_p9)   ;;  %s1809_s30 = smov (!%p315_p9), 4   ;;  %vm657_vm2 = vcmask (!%p315_p9), 1043456   ;;  %vm575_vm3 = vcmask (!%p315_p9), 31744  }
   0xf   : > { %1531 = vmatpush3.bf16.msra.mxu0 (!%p315_p9), %v1704_v3  ;;  %1539 = vmatpush3.bf16.msra.mxu1 (!%p315_p9), %v1705_v4  ;;  %v1960_v8 = vld [vmem:[%s2181_s1] sm:$0xff] (!%p315_p9)  ;;  %s1810_s11 = smov (!%p315_p9), 12   ;;  %s1811_s12 = smov (!%p315_p9), 16   ;;  %v1709_v18 = vld [vmem:[%s2185_s5 + $0x8] sm:$0xff] (!%p315_p9)   ;;  %vm593_vm4 = vcmask (!%p315_p9), 64512   ;;  %vm702_vm6 = vcmask (!%p315_p9), 60416  }
  0x10   : > { %1532 = vmatprep.subr.bf16.mxu0 (!%p315_p9), %v1806_v5  ;;  %1540 = vmatprep.subr.bf16.mxu1 (!%p315_p9), %v1806_v5  ;;  %s1812_s18 = smov (!%p315_p9), 20   ;;  %s1813_s20 = smov (!%p315_p9), 24   ;;  %v1453_v13 = vld [vmem:[%s2182_s2] ss:$0 sm:$0xff] (!%p315_p9)  ;;  %vm839_vm7 = vcmask (!%p315_p9), 126016   ;;  %vm1007_vm8 = vcmask (!%p315_p9), 191616  }
  0x11   : > { %1534 = vmatprep.mubr.msk.bf16.mxu0 (!%p315_p9), %vm1807_vm1, %v1806_v5  ;;  %1542 = vmatprep.mubr.msk.bf16.mxu1 (!%p315_p9), %vm1807_vm1, %v1806_v5  ;;  %s1814_s21 = smov (!%p315_p9), 124   ;;  %v1708_v16 = vld [vmem:[%s2185_s5] sm:$0xff] (!%p315_p9)   ;;  %vm1144_vm9 = vcmask (!%p315_p9), 257216   ;;  %vm1328_vm10 = vcmask (!%p315_p9), 523264  }
  0x13   : > { %1533 = vmatpush3.bf16.msra.mxu0 (!%p315_p9), %v1706_v6  ;;  %1541 = vmatpush3.bf16.msra.mxu1 (!%p315_p9), %v1707_v7 }
  0x14   : > { %1546 = vmatprep.subr.bf16.mxu0 (!%p315_p9), %v1806_v5  ;;  %1554 = vmatprep.subr.bf16.mxu1 (!%p315_p9), %v1806_v5 }
  0x15   : > { %s352_s25 = scalar_select %p351_p10, %s1898_s17, 1 }
  0x17   : > { %s1452_s26 = sshll.u32 %s352_s25, 3  ;;  %s1815_s25 = smov 28  }
  0x18   : > { %s354_s29 = scalar_lea.vmem %s2180_s0, %s1452_s26  ;;  %s1816_s26 = smov 120  }
  0x19   : > { %v1930_v0 = vld [vmem:[%s354_s29] sm:$0xff]  ;;  %s1808_s29 = smov 8  }
  0x1a   : > { %v357_v1 = vmul.f32 %v1930_v0, %v1930_v0  ;;  %704 = vrot.lane.b32.xlu1 %v1960_v8, %s1808_s29 }
  0x1c   : > { %v359_v2 = vsel %vm358_vm0, %v357_v1, 0.0 }
  0x1d   : > { %360 = vadd.xlane.f32.xlu0 %v359_v2 }
  0x1e   : > { %713 = vrot.lane.b32.xlu1 %v1960_v8, %s1810_s11 }
  0x22   : > { %863 = vrot.lane.b32.xlu1 %v1960_v8, %s1811_s12 }
  0x26   : > { %872 = vrot.lane.b32.xlu1 %v1960_v8, %s1812_s18 }
  0x2a   : > { %1009 = vrot.lane.b32.xlu1 %v1960_v8, %s1813_s20 }
  0x2e   : > { %566 = vrot.lane.b32.xlu1 %v1960_v8, %s1814_s21 }
  0x33   : > { %562 = vrot.lane.b32.xlu0 %v1960_v8, %s1809_s30 }
  0x8c   : > { %v705_v19 = vpop.permute.xlu1 %704 }
  0x90   : > { %v714_v20 = vpop.permute.xlu1 %713 }
  0x94   : > { %v864_v22 = vpop.permute.xlu1 %863 }
  0x98   : > { %v873_v35 = vpop.permute.xlu1 %872 }
  0x9c   : > { %v1010_v44 = vpop.permute.xlu1 %1009 }
  0xa0   : > { %v567_v48 = vpop.permute.xlu1 %566 }
  0xaa   : > { %v361_v9 = vpop.xlane.xlu0 %360 }
  0xab   : > { %v363_v10 = vmul.f32 0.03125, %v361_v9 }
  0xad   : > { %v364_v11 = vadd.f32 1e-06, %v363_v10 }
  0xae   : > { %v563_v21 = vpop.permute.xlu0 %562 }
  0xaf   : > { %1718 = vrsqrt.f32 %v364_v11 }
  0xb9   : > { %v1719_v12 = vpop.eup %1718 }
  0xba   : > { %v366_v14 = vmul.f32 %v1719_v12, %v1930_v0 }
  0xbc   : > { %v374_v15 = vmul.f32 %v1453_v13, %v366_v14 }
  0xbe   : > { %v375_v17 = vpack.c.bf16 %v374_v15, %v374_v15 }
  0xc0   : > { %1535 = vmatmul.mubr.msk.bf16.vlgmr.msra.gmra.mrb[0].mxu0 %vm358_vm0, %v375_v17  ;;  %1543 = vmatmul.mubr.msk.bf16.vlgmr.msra.gmra.mrb[0].mxu1 %vm358_vm0, %v375_v17 }
  0xc1   : > { %1547 = vmatpush3.bf16.msra.mxu0 %v1708_v16  ;;  %1550 = vmatprep.mubr.msk.bf16.mxu0 %vm1807_vm1, %v1806_v5 }
  0xc2   : > { %1548 = vmatprep.subr.bf16.mxu0 %v1806_v5  ;;  %1556 = vmatprep.mubr.msk.bf16.mxu1 %vm1807_vm1, %v1806_v5 }
  0xc5   : > { %1549 = vmatpush3.bf16.msra.mxu0 %v1709_v18 }
  0xc6   : > { %1560 = vmatprep.subr.bf16.mxu0 %v1806_v5 }
  0xc8   : > { %1551 = vmatmul.mubr.msk.bf16.vlgmr.msra.gmra.mrb[4].mxu0 %vm358_vm0, %v375_v17 }
  0xc9   : > { %1562 = vmatprep.mubr.msk.bf16.mxu0 %vm1807_vm1, %v1806_v5 }
 0x193   : > { %v1995_v23 = vpop.f32.mrb[0].mxu0  ;;  %v485_v24 = vpop.f32.mrb[0].mxu1 }
 0x194   : > { %v1998_v25 = vmul.f32 %v563_v21, %v1995_v23  ;;  %v1536_v26 = vpop.f32.mrb[1].mxu0  ;;  %v1544_v27 = vpop.f32.mrb[1].mxu1  ;;  %v707_v28 = vmul.f32 %v705_v19, %v1995_v23  ;;  %v2004_v33 = vmul.f32 %v563_v21, %v485_v24  ;;  %v841_v34 = vmul.f32 %v705_v19, %v485_v24 }
 0x195   : > { %v432_v29 = vpop.f32.mrb[2].mxu0  ;;  %v488_v30 = vpop.f32.mrb[2].mxu1  ;;  %v866_v39 = vmul.f32 %v864_v22, %v1995_v23  ;;  %v716_v40 = vmul.f32 %v714_v20, %v1995_v23  ;;  %v1012_v45 = vmul.f32 %v1010_v44, %v1995_v23  ;;  %v875_v46 = vmul.f32 %v873_v35, %v1995_v23 }
 0x196   : > { %v1545_v31 = vpop.f32.mrb[3].mxu1  ;;  %709 = vrot.lane.b32.xlu1 %v707_v28, %s1814_s21  ;;  %v1537_v32 = vpop.f32.mrb[3].mxu0  ;;  %718 = vrot.lane.b32.xlu0 %v1998_v25, %s1809_s30  ;;  %v555_v47 = vmul.f32 %v1960_v8, %v485_v24  ;;  %v569_v49 = vmul.f32 %v567_v48, %v485_v24  ;;  %v578_v50 = vmul.f32 %v1960_v8, %v1995_v23 }
 0x197   : > { %v585_v51 = vmul.f32 %v567_v48, %v1995_v23  ;;  %v847_v57 = vmul.f32 %v714_v20, %v485_v24 }
 0x19a   : > { %843 = vrot.lane.b32.xlu1 %v841_v34, %s1814_s21  ;;  %849 = vrot.lane.b32.xlu0 %v2004_v33, %s1809_s30 }
 0x19b   : > { %v541_v36 = vpop.f32.mrb[4].mxu0 }
 0x19c   : > { %v2009_v37 = vpack.c.bf16 %v541_v36, %v541_v36  ;;  %v1552_v38 = vpop.f32.mrb[5].mxu0 }
 0x19d   : > { %v544_v41 = vpop.f32.mrb[6].mxu0 }
 0x19e   : > { %v2015_v42 = vsel %vm657_vm2, %v2009_v37, 0  ;;  %868 = vrot.lane.b32.xlu1 %v866_v39, %s1814_s21  ;;  %v1553_v43 = vpop.f32.mrb[7].mxu0  ;;  %877 = vrot.lane.b32.xlu0 %v716_v40, %s1809_s30 }
 0x19f   : > { %1561 = vmatpush3.bf16.msra.mxu0 %v2015_v42 }
 0x1a0   : > { %1572 = vmatprep.subr.bf16.mxu0 %v1806_v5 }
 0x1a2   : > { %1018 = vrot.lane.b32.xlu1 %v1960_v8, %s1815_s25  ;;  %1014 = vrot.lane.b32.xlu0 %v1012_v45, %s1814_s21  ;;  %s1820_s25 = smov 64  }
 0x1a6   : > { %1023 = vrot.lane.b32.xlu1 %v875_v46, %s1809_s30  ;;  %557 = vrot.lane.b32.xlu0 %v555_v47, %s1814_s21 }
 0x1aa   : > { %571 = vrot.lane.b32.xlu1 %v569_v49, %s1809_s30  ;;  %580 = vrot.lane.b32.xlu0 %v578_v50, %s1814_s21  ;;  %s1818_s21 = smov 104   ;;  %v549_v49 = vlaneseq }
 0x1ae   : > { %587 = vrot.lane.b32.xlu1 %v585_v51, %s1809_s30  ;;  %s1817_s30 = smov 112   ;;  %v552_v51 = vand.u32 127, %v549_v49 }
 0x208   : > { %v710_v52 = vpop.permute.xlu1 %709  ;;  %v719_v53 = vpop.permute.xlu0 %718 }
 0x209   : > { %v712_v54 = vsub.f32 %v707_v28, %v710_v52  ;;  %v721_v55 = vadd.f32 %v719_v53, %v716_v40  ;;  %v1819_v53 = vmov -1e+30  }
 0x20b   : > { %v1684_v56 = vpack.i.bf16 %v721_v55, %v712_v54 }
 0x20c   : > { %v844_v58 = vpop.permute.xlu1 %843  ;;  %v850_v59 = vpop.permute.xlu0 %849 }
 0x20d   : > { %v846_v60 = vsub.f32 %v841_v34, %v844_v58  ;;  %v852_v61 = vadd.f32 %v850_v59, %v847_v57  ;;  %1685 = vrot.lane.b32.xlu0 %v1684_v56, %s1816_s26 }
 0x20f   : > { %v1689_v62 = vpack.i.bf16 %v852_v61, %v846_v60 }
 0x210   : > { %v869_v63 = vpop.permute.xlu1 %868  ;;  %v878_v1 = vpop.permute.xlu0 %877 }
 0x211   : > { %v871_v2 = vsub.f32 %v866_v39, %v869_v63  ;;  %v880_v3 = vadd.f32 %v878_v1, %v875_v46  ;;  %1690 = vrot.lane.b32.xlu1 %v1689_v62, %s1816_s26 }
 0x213   : > { %v1694_v4 = vpack.i.bf16 %v880_v3, %v871_v2 }
 0x214   : > { %v1019_v6 = vpop.permute.xlu1 %1018  ;;  %v1015_v7 = vpop.permute.xlu0 %1014 }
 0x215   : > { %1695 = vrot.lane.b32.xlu0 %v1694_v4, %s1817_s30  ;;  %v1021_v8 = vmul.f32 %v1019_v6, %v1995_v23  ;;  %v1017_v10 = vsub.f32 %v1012_v45, %v1015_v7 }
 0x218   : > { %v1024_v9 = vpop.permute.xlu1 %1023  ;;  %v558_v12 = vpop.permute.xlu0 %557 }
 0x219   : > { %v1026_v11 = vadd.f32 %v1024_v9, %v1021_v8  ;;  %v560_v15 = vsub.f32 %v555_v47, %v558_v12 }
 0x21b   : > { %v1699_v13 = vpack.i.bf16 %v1026_v11, %v1017_v10 }
 0x21c   : > { %v572_v14 = vpop.permute.xlu1 %571  ;;  %v581_v19 = vpop.permute.xlu0 %580 }
 0x21d   : > { %v574_v16 = vadd.f32 %v572_v14, %v2004_v33  ;;  %1700 = vrot.lane.b32.xlu1 %v1699_v13, %s1818_s21  ;;  %v583_v23 = vsub.f32 %v578_v50, %v581_v19  ;;  %v550_v50 = vshrl.u32 %v549_v49, 7  ;;  %s1488_s21 = sshll.u32 %s1898_s17, 7 }
 0x21f   : > { %v576_v17 = vsel %vm575_vm3, %v560_v15, %v574_v16  ;;  %vm553_vm5 = vcmp.ge.s32.totalorder %v550_v50, %v552_v51 }
 0x220   : > { %v577_v18 = vpack.c.bf16 %v576_v17, %v576_v17  ;;  %v588_v20 = vpop.permute.xlu1 %587  ;;  %v554_v54 = vsel %vm553_vm5, 0.0, %v1819_v53 }
 0x221   : > { %v590_v21 = vadd.f32 %v588_v20, %v1998_v25 }
 0x222   : > { %v598_v22 = vsel %vm593_vm4, %v577_v18, 0 }
 0x223   : > { %1555 = vmatpush3.bf16.xpose.msra.mxu1 %v598_v22  ;;  %v591_v24 = vsel %vm575_vm3, %v583_v23, %v590_v21 }
 0x224   : > { %1566 = vmatprep.subr.bf16.mxu1 %v1806_v5  ;;  %v592_v26 = vpack.c.bf16 %v591_v24, %v591_v24 }
 0x22a   : > { %1557 = vmatmul.mubr.msk.bf16.vlgmr.msra.gmra.mrb[4].mxu1 %vm593_vm4, %v592_v26 }
 0x22b   : > { %1567 = vmatpush3.bf16.xpose.msra.mxu1 %v598_v22  ;;  %1568 = vmatprep.mubr.msk.bf16.mxu1 %vm1807_vm1, %v1806_v5 }
 0x22c   : > { %1578 = vmatprep.subr.bf16.mxu1 %v1806_v5 }
 0x27f   : > { %v1686_v27 = vpop.permute.xlu0 %1685 }
 0x280   : > { %v1688_v28 = vunpack.i.h.bf16 %v1686_v27  ;;  %v1687_v25 = vunpack.i.l.bf16 %v1686_v27 }
 0x282   : > { %v730_v29 = vsel %vm575_vm3, %v1687_v25, %v1688_v28 }
 0x283   : > { %v731_v30 = vpack.c.bf16 %v730_v29, %v730_v29  ;;  %v1691_v31 = vpop.permute.xlu1 %1690 }
 0x284   : > { %v1693_v32 = vunpack.i.h.bf16 %v1691_v31  ;;  %v1692_v33 = vunpack.i.l.bf16 %v1691_v31 }
 0x285   : > { %1569 = vmatmul.mubr.msk.bf16.vlgmr.msra.gmra.mrb[8].mxu1 %vm593_vm4, %v731_v30 }
 0x286   : > { %v861_v34 = vsel %vm575_vm3, %v1692_v33, %v1693_v32  ;;  %1580 = vmatprep.mubr.msk.bf16.mxu1 %vm1807_vm1, %v1806_v5 }
 0x287   : > { %v1696_v35 = vpop.permute.xlu0 %1695  ;;  %v862_v36 = vpack.c.bf16 %v861_v34, %v861_v34 }
 0x288   : > { %v1698_v38 = vunpack.i.h.bf16 %v1696_v35  ;;  %v1697_v39 = vunpack.i.l.bf16 %v1696_v35 }
 0x289   : > { %v895_v40 = vsel %vm593_vm4, %v862_v36, 0 }
 0x28a   : > { %1579 = vmatpush3.bf16.xpose.msra.mxu1 %v895_v40  ;;  %v889_v41 = vsel %vm575_vm3, %v1697_v39, %v1698_v38 }
 0x28b   : > { %1590 = vmatprep.subr.bf16.mxu1 %v1806_v5  ;;  %v890_v43 = vpack.c.bf16 %v889_v41, %v889_v41 }
 0x28f   : > { %v1701_v44 = vpop.permute.xlu1 %1700 }
 0x290   : > { %v1703_v45 = vunpack.i.h.bf16 %v1701_v44  ;;  %v1702_v46 = vunpack.i.l.bf16 %v1701_v44 }
 0x291   : > { %1581 = vmatmul.mubr.msk.bf16.vlgmr.msra.gmra.mrb[12].mxu1 %vm593_vm4, %v890_v43 }
 0x292   : > { %1591 = vmatpush3.bf16.xpose.msra.mxu1 %v895_v40  ;;  %1592 = vmatprep.mubr.msk.bf16.mxu1 %vm1807_vm1, %v1806_v5  ;;  %v1035_v47 = vsel %vm575_vm3, %v1702_v46, %v1703_v45 }
 0x293   : > { %1602 = vmatprep.subr.bf16.mxu1 %v1806_v5  ;;  %v1036_v48 = vpack.c.bf16 %v1035_v47, %v1035_v47 }
 0x299   : > { %1593 = vmatmul.mubr.msk.bf16.vlgmr.msra.gmra.mrb[16].mxu1 %vm593_vm4, %v1036_v48 }
 0x29a   : > { %1606 = vmatprep.mubr.msk.bf16.mxu1 %vm1807_vm1, %v1806_v5 }
 0x2fd   : > { %v634_v52 = vpop.f32.mrb[4].mxu1 }
 0x2fe   : > { %v640_v55 = vmul.f32 0.35355338, %v634_v52  ;;  %v1558_v56 = vpop.f32.mrb[5].mxu1 }
 0x2ff   : > { %v637_v57 = vpop.f32.mrb[6].mxu1 }
 0x300   : > { %v1559_v58 = vpop.f32.mrb[7].mxu1  ;;  %v641_v59 = vadd.f32 %v640_v55, %v554_v54 }
 0x302   : > { %v642_v60 = vsel %vm593_vm4, %v641_v59, -inf }
 0x303   : > { %643 = vmax.xlane.f32.xlu0 %v642_v60 }
 0x358   : > { %v769_v61 = vpop.f32.mrb[8].mxu1 }
 0x359   : > { %v775_v62 = vmul.f32 0.35355338, %v769_v61  ;;  %v1570_v63 = vpop.f32.mrb[9].mxu1 }
 0x35a   : > { %v772_v1 = vpop.f32.mrb[10].mxu1 }
 0x35b   : > { %v1571_v2 = vpop.f32.mrb[11].mxu1  ;;  %v776_v3 = vadd.f32 %v775_v62, %v554_v54 }
 0x35d   : > { %v777_v4 = vsel %vm593_vm4, %v776_v3, -inf }
 0x35e   : > { %778 = vmax.xlane.f32.xlu1 %v777_v4 }
 0x364   : > { %v931_v6 = vpop.f32.mrb[12].mxu1 }
 0x365   : > { %v937_v7 = vmul.f32 0.35355338, %v931_v6  ;;  %v1582_v8 = vpop.f32.mrb[13].mxu1  ;;  %v1710_v6 = vld [vmem:[%s2186_s6] sm:$0xff]  }
 0x366   : > { %v934_v9 = vpop.f32.mrb[14].mxu1  ;;  %1603 = vmatpush3.bf16.msra.mxu1 %v1710_v6  ;;  %v1711_v8 = vld [vmem:[%s2186_s6 + $0x8] sm:$0xff]  }
 0x367   : > { %v1583_v10 = vpop.f32.mrb[15].mxu1  ;;  %v938_v11 = vadd.f32 %v937_v7, %v554_v54  ;;  %1604 = vmatprep.subr.bf16.mxu1 %v1806_v5 }
 0x369   : > { %v939_v12 = vsel %vm593_vm4, %v938_v11, -inf }
 0x36a   : > { %940 = vmax.xlane.f32.xlu0 %v939_v12  ;;  %1605 = vmatpush3.bf16.msra.mxu1 %v1711_v8 }
 0x36b   : > { %1618 = vmatprep.subr.bf16.mxu1 %v1806_v5 }
 0x36c   : > { %v1074_v13 = vpop.f32.mrb[16].mxu1 }
 0x36d   : > { %v1080_v14 = vmul.f32 0.35355338, %v1074_v13  ;;  %v1594_v15 = vpop.f32.mrb[17].mxu1 }
 0x36e   : > { %v1077_v16 = vpop.f32.mrb[18].mxu1 }
 0x36f   : > { %v1595_v17 = vpop.f32.mrb[19].mxu1  ;;  %v1081_v18 = vadd.f32 %v1080_v14, %v554_v54 }
 0x371   : > { %v1082_v19 = vsel %vm593_vm4, %v1081_v18, -inf }
 0x372   : > { %1083 = vmax.xlane.f32.xlu0 %v1082_v19 }
 0x390   : > { %v644_v20 = vpop.xlane.xlu0 %643 }
 0x391   : > { %v645_v21 = vsub.f32 %v641_v59, %v644_v20 }
 0x393   : > { %v646_v22 = vmul.f32 1.442695, %v645_v21 }
 0x395   : > { %1720 = vpow2.f32 %v646_v22 }
 0x39f   : > { %v1721_v23 = vpop.eup %1720 }
 0x3a0   : > { %v648_v24 = vsel %vm593_vm4, %v1721_v23, 0.0 }
 0x3a1   : > { %649 = vadd.xlane.f32.xlu1 %v648_v24 }
 0x3eb   : > { %v779_v26 = vpop.xlane.xlu1 %778 }
 0x3ec   : > { %v780_v27 = vsub.f32 %v776_v3, %v779_v26 }
 0x3ee   : > { %v781_v28 = vmul.f32 1.442695, %v780_v27 }
 0x3f0   : > { %1722 = vpow2.f32 %v781_v28 }
 0x3f7   : > { %v941_v25 = vpop.xlane.xlu0 %940 }
 0x3f8   : > { %v942_v29 = vsub.f32 %v938_v11, %v941_v25 }
 0x3fa   : > { %v1723_v30 = vpop.eup %1722  ;;  %v943_v31 = vmul.f32 1.442695, %v942_v29  ;;  %v1712_v29 = vld [vmem:[%s2188_s8] sm:$0xff]  }
 0x3fb   : > { %v783_v32 = vsel %vm593_vm4, %v1723_v30, 0.0 }
 0x3fc   : > { %1724 = vpow2.f32 %v943_v31  ;;  %784 = vadd.xlane.f32.xlu0 %v783_v32 }
 0x3ff   : > { %v1084_v33 = vpop.xlane.xlu0 %1083 }
 0x400   : > { %v1085_v34 = vsub.f32 %v1081_v18, %v1084_v33 }
 0x402   : > { %v1086_v35 = vmul.f32 1.442695, %v1085_v34  ;;  %v1477_v34 = vld [vmem:[%s2187_s7] ss:$0 sm:$0xff] }
 0x404   : > { %1726 = vpow2.f32 %v1086_v35 }
 0x406   : > { %v1725_v36 = vpop.eup %1724 }
 0x407   : > { %v945_v38 = vsel %vm593_vm4, %v1725_v36, 0.0 }
 0x408   : > { %946 = vadd.xlane.f32.xlu1 %v945_v38 }
 0x40e   : > { %v1727_v39 = vpop.eup %1726 }
 0x40f   : > { %v1088_v40 = vsel %vm593_vm4, %v1727_v39, 0.0 }
 0x410   : > { %1089 = vadd.xlane.f32.xlu0 %v1088_v40  ;;  %v1715_v40 = vld [vmem:[%s2189_s9 + $0x8] sm:$0xff]  }
 0x419   : > { %952 = vrot.lane.b32.xlu1 %v2009_v37, %s1816_s26  ;;  %s348_s26 = sand.u32 1, %s1796_s14  }
 0x41a   : > { %s1451_s30 = sshll.u32 %s348_s26, 3  ;;  %s1375_s17 = scalar_lea.sflag [#allocation4], %s348_s26 }
 0x41b   : > { %s350_s27 = scalar_lea.vmem [#allocation3], %s1451_s30 }
 0x41c   : > { %s1388_s28 = sshll.u32 %s350_s27, 4  ;;  %s2139_s28 = int_to_ptr.vmem [resolvable:$true] %s1388_s28 }
 0x42e   : > { %v650_v41 = vpop.xlane.xlu1 %649 }
 0x42f   : > { %1728 = vrcp.f32 %v650_v41  ;;  %v1716_v41 = vld [vmem:[%s2189_s9 + $0x10] sm:$0xff]  }
 0x439   : > { %v1729_v43 = vpop.eup %1728 }
 0x43a   : > { %v652_v44 = vmul.f32 %v1729_v43, %v1721_v23  ;;  %v1717_v43 = vld [vmem:[%s2189_s9 + $0x18] sm:$0xff]  }
 0x43c   : > { %v653_v45 = vpack.c.bf16 %v652_v44, %v652_v44 }
 0x43e   : > { %1563 = vmatmul.mubr.msk.bf16.vlgmr.msra.gmra.mrb[8].mxu0 %vm593_vm4, %v653_v45 }
 0x43f   : > { %1573 = vmatpush3.bf16.msra.mxu0 %v2015_v42  ;;  %1574 = vmatprep.mubr.msk.bf16.mxu0 %vm1807_vm1, %v1806_v5 }
 0x440   : > { %1584 = vmatprep.subr.bf16.mxu0 %v1806_v5 }
 0x489   : > { %v785_v46 = vpop.xlane.xlu0 %784 }
 0x48a   : > { %1730 = vrcp.f32 %v785_v46 }
 0x494   : > { %v1731_v47 = vpop.eup %1730 }
 0x495   : > { %v787_v48 = vmul.f32 %v1731_v47, %v1723_v30  ;;  %v947_v49 = vpop.xlane.xlu1 %946  ;;  %v1713_v30 = vld [vmem:[%s2188_s8 + $0x8] sm:$0xff]  }
 0x496   : > { %1732 = vrcp.f32 %v947_v49 }
 0x497   : > { %v788_v37 = vpack.c.bf16 %v787_v48, %v787_v48 }
 0x499   : > { %v953_v50 = vpop.permute.xlu1 %952  ;;  %1575 = vmatmul.mubr.msk.bf16.vlgmr.msra.gmra.mrb[12].mxu0 %vm593_vm4, %v788_v37 }
 0x49a   : > { %v958_v51 = vsel %vm657_vm2, %v953_v50, 0  ;;  %1586 = vmatprep.mubr.msk.bf16.mxu0 %vm1807_vm1, %v1806_v5 }
 0x49b   : > { %1585 = vmatpush3.bf16.msra.mxu0 %v958_v51 }
 0x49c   : > { %1596 = vmatprep.subr.bf16.mxu0 %v1806_v5 }
 0x49d   : > { %v1090_v42 = vpop.xlane.xlu0 %1089 }
 0x49e   : > { %1734 = vrcp.f32 %v1090_v42 }
 0x4a0   : > { %v1733_v52 = vpop.eup %1732 }
 0x4a1   : > { %v949_v53 = vmul.f32 %v1733_v52, %v1725_v36 }
 0x4a3   : > { %v950_v54 = vpack.c.bf16 %v949_v53, %v949_v53 }
 0x4a5   : > { %1587 = vmatmul.mubr.msk.bf16.vlgmr.msra.gmra.mrb[16].mxu0 %vm593_vm4, %v950_v54 }
 0x4a6   : > { %1597 = vmatpush3.bf16.msra.mxu0 %v958_v51  ;;  %1598 = vmatprep.mubr.msk.bf16.mxu0 %vm1807_vm1, %v1806_v5 }
 0x4a7   : > { %1610 = vmatprep.subr.bf16.mxu0 %v1806_v5 }
 0x4a8   : > { %v1735_v55 = vpop.eup %1734 }
 0x4a9   : > { %v1092_v56 = vmul.f32 %v1735_v55, %v1727_v39  ;;  %v1714_v39 = vld [vmem:[%s2189_s9] sm:$0xff]  }
 0x4ab   : > { %v1093_v57 = vpack.c.bf16 %v1092_v56, %v1092_v56 }
 0x4ad   : > { %1599 = vmatmul.mubr.msk.bf16.vlgmr.msra.gmra.mrb[20].mxu0 %vm593_vm4, %v1093_v57 }
 0x4ae   : > { %1614 = vmatprep.mubr.msk.bf16.mxu0 %vm1807_vm1, %v1806_v5  ;;  %1611 = vmatpush3.bf16.msra.mxu0 %v1712_v29 }
 0x4af   : > { %1612 = vmatprep.subr.bf16.mxu0 %v1806_v5 }
 0x4b2   : > { %1613 = vmatpush3.bf16.msra.mxu0 %v1713_v30 }
 0x511   : > { %v695_v58 = vpop.f32.mrb[8].mxu0 }
 0x512   : > { %v701_v59 = vpack.c.bf16 %v695_v58, %v695_v58  ;;  %v1564_v60 = vpop.f32.mrb[9].mxu0 }
 0x513   : > { %v698_v61 = vpop.f32.mrb[10].mxu0 }
 0x514   : > { %703 = vst.msk [vmem:[#allocation2] sm:$0xf] %vm702_vm6, %v701_v59  ;;  %v1565_v62 = vpop.f32.mrb[11].mxu0 }
 0x56c   : > { %v826_v63 = vpop.f32.mrb[12].mxu0 }
 0x56d   : > { %v1491_v1 = vpack.c.bf16 %v826_v63, %v826_v63  ;;  %v1576_v2 = vpop.f32.mrb[13].mxu0 }
 0x56e   : > { %v829_v3 = vpop.f32.mrb[14].mxu0 }
 0x56f   : > { %836 = vrot.lane.b32.xlu0 %v1491_v1, %s1808_s29  ;;  %v1577_v4 = vpop.f32.mrb[15].mxu0  ;;  %s2137_s29 = scalar_lea.hbm %s2190_s10, %s1488_s21 }
 0x578   : > { %v994_v7 = vpop.f32.mrb[16].mxu0 }
 0x579   : > { %v1492_v9 = vpack.c.bf16 %v994_v7, %v994_v7  ;;  %v1588_v10 = vpop.f32.mrb[17].mxu0 }
 0x57a   : > { %v997_v11 = vpop.f32.mrb[18].mxu0 }
 0x57b   : > { %1004 = vrot.lane.b32.xlu1 %v1492_v9, %s1811_s12  ;;  %v1589_v12 = vpop.f32.mrb[19].mxu0  ;;  %s1742_s12 = scalar_lea.vmem %s2139_s28, 128 }
 0x57c   : > { %p1743_p11 = scmp.ne.s32.totalorder %s2139_s28, %s1742_s12 }
 0x57e   : > { %p1744_p12 = pnand %p1743_p11, %p1915_p5 }
 0x580   : > { %v1131_v13 = vpop.f32.mrb[20].mxu0  ;;  %p1745_p13 = pneg %p1744_p12 }
 0x581   : > { %v1493_v14 = vpack.c.bf16 %v1131_v13, %v1131_v13  ;;  %v1600_v15 = vpop.f32.mrb[21].mxu0 }
 0x582   : > { %v1134_v16 = vpop.f32.mrb[22].mxu0 }
 0x583   : > { %1141 = vrot.lane.b32.xlu1 %v1493_v14, %s1813_s20  ;;  %v1601_v17 = vpop.f32.mrb[23].mxu0  ;;  %s1821_s20 = smov [#allocation3]  }
 0x5e1   : > { %v837_v18 = vpop.permute.xlu0 %836 }
 0x5e2   : > { %840 = vst.msk [vmem:[#allocation2] sm:$0xf] %vm839_vm7, %v837_v18 }
 0x5ed   : > { %v1005_v19 = vpop.permute.xlu1 %1004 }
 0x5ee   : > { %1008 = vst.msk [vmem:[#allocation2] sm:$0xf] %vm1007_vm8, %v1005_v19 }
 0x5f5   : > { %v1142_v20 = vpop.permute.xlu1 %1141 }
 0x5f6   : > { %1145 = vst.msk [vmem:[#allocation2] sm:$0xf] %vm1144_vm9, %v1142_v20 }
 0x5fd   : > { %v1146_v21 = vld [vmem:[#allocation2] sm:$0xf] }
 0x5fe   : > { %1607 = vmatmul.mubr.msk.bf16.vlgmr.msra.gmra.mrb[20].mxu1 %vm358_vm0, %v1146_v21 }
 0x5ff   : > { %1626 = vmatprep.mubr.msk.bf16.mxu1 %vm1807_vm1, %v1806_v5  ;;  %1619 = vmatpush3.bf16.msra.mxu1 %v1714_v39 }
 0x600   : > { %1620 = vmatprep.subr.bf16.mxu1 %v1806_v5 }
 0x603   : > { %1621 = vmatpush3.bf16.msra.mxu1 %v1715_v40 }
 0x604   : > { %1622 = vmatprep.subr.bf16.mxu1 %v1806_v5 }
 0x607   : > { %1623 = vmatpush3.bf16.msra.mxu1 %v1716_v41 }
 0x608   : > { %1624 = vmatprep.subr.bf16.mxu1 %v1806_v5 }
 0x60b   : > { %1625 = vmatpush3.bf16.msra.mxu1 %v1717_v43 }
 0x6d1   : > { %v1200_v22 = vpop.f32.mrb[20].mxu1 }
 0x6d2   : > { %v1206_v23 = vadd.f32 %v1200_v22, %v1930_v0  ;;  %v1608_v24 = vpop.f32.mrb[21].mxu1 }
 0x6d3   : > { %v1203_v26 = vpop.f32.mrb[22].mxu1 }
 0x6d4   : > { %v1609_v27 = vpop.f32.mrb[23].mxu1  ;;  %v1207_v28 = vmul.f32 %v1206_v23, %v1206_v23 }
 0x6d6   : > { %v1208_v25 = vsel %vm358_vm0, %v1207_v28, 0.0 }
 0x6d7   : > { %1209 = vadd.xlane.f32.xlu0 %v1208_v25 }
 0x764   : > { %v1210_v0 = vpop.xlane.xlu0 %1209 }
 0x765   : > { %v1211_v31 = vmul.f32 0.03125, %v1210_v0 }
 0x767   : > { %v1212_v32 = vadd.f32 1e-06, %v1211_v31 }
 0x769   : > { %1736 = vrsqrt.f32 %v1212_v32 }
 0x773   : > { %v1737_v33 = vpop.eup %1736 }
 0x774   : > { %v1214_v35 = vmul.f32 %v1737_v33, %v1206_v23 }
 0x776   : > { %v1222_v36 = vmul.f32 %v1477_v34, %v1214_v35 }
 0x778   : > { %v1223_v38 = vpack.c.bf16 %v1222_v36, %v1222_v36 }
 0x77a   : > { %1615 = vmatmul.mubr.msk.bf16.vlgmr.msra.gmra.mrb[24].mxu0 %vm358_vm0, %v1223_v38 }
 0x84d   : > { %v1277_v44 = vpop.f32.mrb[24].mxu0 }
 0x84e   : > { %1291 = vrot.lane.b32.xlu1 %v1277_v44, %s1820_s25  ;;  %v1616_v45 = vpop.f32.mrb[25].mxu0  ;;  %v1481_v48 = vmul.f32 -1.442695, %v1277_v44  ;;  %s1746_s25 = sshll.u32 %s1821_s20, 4  ;;  %s1747_s25 = int_to_ptr.vmem [resolvable:$false] %s1746_s25 }
 0x84f   : > { %v1280_v46 = vpop.f32.mrb[26].mxu0  ;;  %s1748_s30 = scalar_lea.vmem %s1747_s25, 256  ;;  %p1749_p0 = scmp.lt.s32.totalorder %s2139_s28, %s1747_s25 }
 0x850   : > { %v1617_v47 = vpop.f32.mrb[27].mxu0  ;;  %1738 = vpow2.f32 %v1481_v48  ;;  %p1750_p1 = scmp.lt.s32.totalorder %s1748_s30, %s1742_s12 }
 0x852   : > { %p1751_p2 = por %p1750_p1, %p1749_p0 }
 0x854   : > { %p1752_p3 = pnand %p1751_p2, %p1745_p13 }
 0x85a   : > { %v1739_v49 = vpop.eup %1738 }
 0x85b   : > { %v1286_v37 = vadd.f32 1.0, %v1739_v49 }
 0x85d   : > { %1740 = vrcp.f32 %v1286_v37 }
 0x867   : > { %v1741_v50 = vpop.eup %1740 }
 0x868   : > { %v1289_v5 = vmul.f32 %v1741_v50, %v1277_v44 }
 0x8c0   : > { %v1292_v51 = vpop.permute.xlu1 %1291 }
 0x8c1   : > { %v1294_v42 = vmul.f32 %v1292_v51, %v1289_v5 }
 0x8c3   : > { %v1295_v52 = vpack.c.bf16 %v1294_v42, %v1294_v42 }
 0x8c5   : > { %1627 = vmatmul.mubr.msk.bf16.vlgmr.msra.gmra.mrb[24].mxu1 %vm1328_vm10, %v1295_v52 }
 0x998   : > { %v1366_v53 = vpop.f32.mrb[24].mxu1 }
 0x999   : > { %v1372_v54 = vadd.f32 %v1366_v53, %v1206_v23  ;;  %v1628_v55 = vpop.f32.mrb[25].mxu1 }
 0x99a   : > { %v1369_v56 = vpop.f32.mrb[26].mxu1 }
 0x99b   : > { %v1629_v57 = vpop.f32.mrb[27].mxu1  ;;  %1373 = vst.msk [vmem:[%s350_s27] sm:$0xff] %vm358_vm0, %v1372_v54 }
 0x99c   : > { %1755 = shalt.err (!%p1752_p3)
}
 0x99d   : > { %s1756_s26 = scalar_lea.hbm %s2137_s29, 128  ;;  %s1760_s11 = scalar_lea.hbm %s2190_s10, 256 }
 0x99e   : > { %p1757_p4 = scmp.ne.s32.totalorder %s2137_s29, %s1756_s26  ;;  %p1761_p9 = scmp.lt.u32.totalorder %s2137_s29, %s2190_s10 }
 0x99f   : > { %p1762_p10 = scmp.lt.u32.totalorder %s1760_s11, %s1756_s26  ;;  %p1764_p12 = scmp.lt.u32.totalorder %s1756_s26, %s2137_s29 }
 0x9a0   : > { %p1758_p7 = pnand %p1757_p4, %p1915_p5 }
 0x9a1   : > { %p1763_p11 = por %p1762_p10, %p1761_p9 }
 0x9a2   : > { %p1759_p8 = pneg %p1758_p7 }
 0x9a3   : > { %p1765_p13 = por %p1764_p12, %p1763_p11 }
 0x9a5   : > { %p1766_p0 = pnand %p1765_p13, %p1759_p8 }
 0x9a7   : > { %1769 = shalt.err (!%p1766_p0)
}
 0x9a8   : > { %1630 = dma.vmem_to_hbm [thread:$0]  (%p1915_p5), %s2139_s28, 128, %s2137_s29, %s1375_s17  }
 0x9a9 PF: > { %p1636_p1 = scmp.ge.s32.totalorder %s1804_s16, 2  ;;  %s1400_s12 = sand.u32 1, %s1792_s13  }
 0x9aa   : > { %s1401_s25 = scalar_lea.sflag [#allocation4], %s1400_s12 }
 0x9ab   : > { %p1633_p2 = pnand %p1636_p1, %p1919_p6 }
 0x9ad   : > { %1787 = dma.done.wait (!%p1633_p2), %s1401_s25, 128  }
 0x9ae   : > { %1789 = vsyncadd (!%p1633_p2), %s1401_s25, 4294967168  ;;  %p20_p3 = scmp.ge.s32.totalorder %s1902_s19, 4   ;;  %s2193_s13 = smov %s1796_s14 }
 0x9af   : > { %s2194_s14 = smov %s1800_s15  ;;  %s2195_s15 = smov %s1913_s22 }
 0x9b0   : > { %s2196_s16 = smov %s1902_s19  ;;  %22 = sbr.rel (!%p20_p3) target bundleno = 3 (0x3), region = 95 }
 0x9b7   :  { %1406 = vsyncpa [#allocation4], 1 }
 0x9b8   :  { %1408 = vsyncpa [#allocation4 + $0x1], 1 }

</bundles_post_ra>
